<compile_context>
chip_gen: v7x
topology: tpu7x:2x2x1
jax: 0.10.0
libtpu: 0.0.40
codegen_flags: <defaults>
</compile_context>

<pallas_src>
import functools

import jax
import jax.numpy as jnp
from jax.experimental import pallas as pl
from jax.experimental.pallas import tpu as pltpu

LANE = 128


def _round_up(v, m):
    return ((v + m - 1) // m) * m


def _vmem_capacity_bytes():
    """Physical VMEM per core (v5e/v6e: 128 MiB, v7x: 64 MiB); safe fallback."""
    try:
        cap = getattr(pltpu.get_tpu_info(), "vmem_capacity_bytes", None)
        if cap:
            return int(cap)
    except Exception:
        pass
    return 64 * 1024 * 1024  # conservative (v7x physical VMEM)


# ---------------------------------------------------------------------------
# Parameter / graph preparation (pure; cache results for repeated calls).
# ---------------------------------------------------------------------------
def _stack_weight(w, in_dim, in_pad, out_dim, out_pad):
    """(out, 3*in) nn.Linear weight -> (3*in_pad, out_pad) bf16 stacked operand."""
    wb = w.astype(jnp.bfloat16)
    ws = jnp.zeros((3 * in_pad, out_pad), jnp.bfloat16)
    for k in range(3):
        blk = wb[:, k * in_dim:(k + 1) * in_dim].T        # (in_dim, out_dim)
        ws = ws.at[k * in_pad:k * in_pad + in_dim, :out_dim].set(blk)
    return ws


def _pad2_bf16(a, rows, cols):
    """Zero-pad a 2-D array into a (rows, cols) bf16 buffer (no f32 intermediate)."""
    out = jnp.zeros((rows, cols), jnp.bfloat16)
    return out.at[:a.shape[0], :a.shape[1]].set(a.astype(jnp.bfloat16))


# ---------------------------------------------------------------------------
# Fast path: everything VMEM-resident, single program (no grid, no pipelining).
# ---------------------------------------------------------------------------
def _tagconvn_resident_kernel(adj_ref, x0_ref, w1_ref, b1_ref, w2_ref, b2_ref,
                              out_ref, *, n_nodes, n_pad, f_pad, h_pad):
    adj = adj_ref[...]                       # (n_pad, n_pad) bf16, loaded once
    x0 = x0_ref[...]                         # (n_pad, f_pad)  bf16

    # ---- layer 1: two hops + concat-linear (three K=128 dots) + relu -------
    x1 = jnp.dot(adj, x0, preferred_element_type=jnp.float32).astype(jnp.bfloat16)
    x2 = jnp.dot(adj, x1, preferred_element_type=jnp.float32).astype(jnp.bfloat16)
    h = jnp.dot(x0, w1_ref[pl.ds(0, f_pad), :], preferred_element_type=jnp.float32)
    h += jnp.dot(x1, w1_ref[pl.ds(f_pad, f_pad), :], preferred_element_type=jnp.float32)
    h += jnp.dot(x2, w1_ref[pl.ds(2 * f_pad, f_pad), :], preferred_element_type=jnp.float32)
    h = jnp.maximum(h + b1_ref[...], 0.0).astype(jnp.bfloat16)

    # ---- layer 2 ------------------------------------------------------------
    h1 = jnp.dot(adj, h, preferred_element_type=jnp.float32).astype(jnp.bfloat16)
    h2 = jnp.dot(adj, h1, preferred_element_type=jnp.float32).astype(jnp.bfloat16)
    z = jnp.dot(h, w2_ref[pl.ds(0, h_pad), :], preferred_element_type=jnp.float32)
    z += jnp.dot(h1, w2_ref[pl.ds(h_pad, h_pad), :], preferred_element_type=jnp.float32)
    z += jnp.dot(h2, w2_ref[pl.ds(2 * h_pad, h_pad), :], preferred_element_type=jnp.float32)
    z = jnp.maximum(z + b2_ref[...], 0.0)

    # ---- mean over real nodes (mask node-padding rows) ----------------------
    row_ids = jax.lax.broadcasted_iota(jnp.int32, (n_pad, 1), 0)
    valid = (row_ids < n_nodes).astype(jnp.float32)
    out_ref[...] = jnp.sum(z * valid, axis=0, keepdims=True) * (1.0 / n_nodes)


# ---------------------------------------------------------------------------
# Streamed path: adjacency streamed once per hop in (tile_n, n_pad) slabs,
# hop features resident in VMEM scratch.  grid = (stage, row_tile).
# ---------------------------------------------------------------------------
def _tagconvn_streamed_kernel(adj_ref, x0_ref, w1_ref, b1_ref, w2_ref, b2_ref,
                              out_ref,
                              hop_buf, h_buf, acc_ref,
                              *, tile_n, n_nodes, f_pad, h_pad):
    s = pl.program_id(0)          # hop/layer stage (depends on full previous hop)
    t = pl.program_id(1)          # destination-row tile
    n_tiles = pl.num_programs(1)

    row_start = pl.multiple_of(t * tile_n, tile_n)
    rows = pl.ds(row_start, tile_n)

    adj_t = adj_ref[...]          # (tile_n, n_pad) bf16 slab streamed from HBM

    @pl.when(jnp.logical_and(s == 0, t == 0))
    def _init():
        acc_ref[...] = jnp.zeros_like(acc_ref)

    # ---- stage 0: x1 = Ahat @ x0 -------------------------------------------
    @pl.when(s == 0)
    def _stage0():
        x1_t = jnp.dot(adj_t, x0_ref[...], preferred_element_type=jnp.float32)
        hop_buf[rows, pl.ds(0, f_pad)] = x1_t.astype(jnp.bfloat16)

    # ---- stage 1: x2 = Ahat @ x1 ; h = relu(x0@W1a + x1@W1b + x2@W1c + b1) --
    @pl.when(s == 1)
    def _stage1():
        x2_t = jnp.dot(adj_t, hop_buf[:, pl.ds(0, f_pad)],
                       preferred_element_type=jnp.float32)
        acc = jnp.dot(x0_ref[rows, :], w1_ref[pl.ds(0, f_pad), :],
                      preferred_element_type=jnp.float32)
        acc += jnp.dot(hop_buf[rows, pl.ds(0, f_pad)], w1_ref[pl.ds(f_pad, f_pad), :],
                       preferred_element_type=jnp.float32)
        acc += jnp.dot(x2_t.astype(jnp.bfloat16), w1_ref[pl.ds(2 * f_pad, f_pad), :],
                       preferred_element_type=jnp.float32)
        h_buf[rows, :] = jnp.maximum(acc + b1_ref[...], 0.0).astype(jnp.bfloat16)

    # ---- stage 2: h1 = Ahat @ h  (hop_buf reused: x1 is dead) ----------------
    @pl.when(s == 2)
    def _stage2():
        h1_t = jnp.dot(adj_t, h_buf[...], preferred_element_type=jnp.float32)
        hop_buf[rows, pl.ds(0, h_pad)] = h1_t.astype(jnp.bfloat16)

    # ---- stage 3: h2 = Ahat @ h1 ; z = relu(...) ; masked node-sum ----------
    @pl.when(s == 3)
    def _stage3():
        h2_t = jnp.dot(adj_t, hop_buf[:, pl.ds(0, h_pad)],
                       preferred_element_type=jnp.float32)
        acc = jnp.dot(h_buf[rows, :], w2_ref[pl.ds(0, h_pad), :],
                      preferred_element_type=jnp.float32)
        acc += jnp.dot(hop_buf[rows, pl.ds(0, h_pad)], w2_ref[pl.ds(h_pad, h_pad), :],
                       preferred_element_type=jnp.float32)
        acc += jnp.dot(h2_t.astype(jnp.bfloat16), w2_ref[pl.ds(2 * h_pad, h_pad), :],
                       preferred_element_type=jnp.float32)
        z_t = jnp.maximum(acc + b2_ref[...], 0.0)
        row_ids = jax.lax.broadcasted_iota(jnp.int32, (tile_n, 1), 0) + row_start
        valid = (row_ids < n_nodes).astype(jnp.float32)
        acc_ref[...] += jnp.sum(z_t * valid, axis=0, keepdims=True)

    @pl.when(jnp.logical_and(s == pl.num_programs(0) - 1, t == n_tiles - 1))
    def _finalize():
        out_ref[...] = acc_ref[...] * (1.0 / n_nodes)


# ---------------------------------------------------------------------------
# Wrapper
# ---------------------------------------------------------------------------
def tagconvn_forward(adj, x, w1, b1, w2, b2, *, tile_n=None, force_streamed=False):
    """adj: (N, N) symmetric-normalized dense adjacency (f32). x: (N, Fin).
    w1: (H, 3*Fin), b1: (H,), w2: (C, 3*H), b2: (C,)   (nn.Linear: y = x @ W.T + b).
    Returns (1, C) float32."""
    n, fin = x.shape
    h_feats = w1.shape[0]
    num_classes = w2.shape[0]

    f_pad = _round_up(fin, LANE)
    h_pad = _round_up(h_feats, LANE)
    c_pad = _round_up(num_classes, LANE)
    hop_lanes = max(f_pad, h_pad)
    vmem_cap = _vmem_capacity_bytes()

    # Stacked / padded parameters (bf16 weights, f32 biases).  In a training or
    # repeated-inference loop these (and adj_p / x_p below) should be prepared
    # once per graph/model and cached by the caller.
    w1s = _stack_weight(w1, fin, f_pad, h_feats, h_pad)
    w2s = _stack_weight(w2, h_feats, h_pad, num_classes, c_pad)
    b1p = jnp.zeros((1, h_pad), jnp.float32).at[0, :h_feats].set(b1)
    b2p = jnp.zeros((1, c_pad), jnp.float32).at[0, :num_classes].set(b2)

    # -------------------- adjacency-resident fast path -----------------------
    n_pad_res = _round_up(n, LANE)
    resident_need = (n_pad_res * n_pad_res * 2                       # adj (bf16)
                     + n_pad_res * f_pad * 2                         # x0
                     + 6 * n_pad_res * max(hop_lanes, c_pad) * 4     # hop temporaries
                     + (3 * f_pad * h_pad + 3 * h_pad * c_pad) * 2)  # weights
    use_resident = (not force_streamed) and resident_need <= int(0.6 * vmem_cap)

    if use_resident:
        n_pad = n_pad_res
        adj_p = _pad2_bf16(adj, n_pad, n_pad)
        x_p = _pad2_bf16(x, n_pad, f_pad)
        kernel = functools.partial(_tagconvn_resident_kernel, n_nodes=n,
                                   n_pad=n_pad, f_pad=f_pad, h_pad=h_pad)
        # No grid: every operand is a single VMEM-resident copy (no pipelining,
        # no double-buffering, adjacency read from HBM exactly once).
        out = pl.pallas_call(
            kernel,
            out_shape=jax.ShapeDtypeStruct((1, c_pad), jnp.float32),
            compiler_params=pltpu.CompilerParams(
                vmem_limit_bytes=int(0.85 * vmem_cap)),
        )(adj_p, x_p, w1s, b1p, w2s, b2p)
        return out[:, :num_classes]

    # ----------------------------- streamed path -----------------------------
    # TODO(synk): if even tile_n=128 resident features do not fit VMEM the
    #             feature matrices would need streaming too; not handled.
    if tile_n is None:
        tile_n = 128
        for cand in (512, 256, 128):
            np_c = _round_up(n, cand)
            need = (2 * cand * np_c * 2                             # adj double buffer
                    + np_c * (f_pad + hop_lanes + h_pad) * 2        # x0 + hop + h scratch
                    + (3 * f_pad * h_pad + 3 * h_pad * c_pad) * 2)  # weights
            if need <= int(0.7 * vmem_cap):
                tile_n = cand
                break
    n_pad = _round_up(n, tile_n)
    n_tiles = n_pad // tile_n

    adj_p = _pad2_bf16(adj, n_pad, n_pad)
    x_p = _pad2_bf16(x, n_pad, f_pad)

    kernel = functools.partial(_tagconvn_streamed_kernel, tile_n=tile_n,
                               n_nodes=n, f_pad=f_pad, h_pad=h_pad)

    vmem_space = pltpu.MemorySpace.VMEM
    out = pl.pallas_call(
        kernel,
        out_shape=jax.ShapeDtypeStruct((1, c_pad), jnp.float32),
        grid_spec=pltpu.PrefetchScalarGridSpec(
            num_scalar_prefetch=0,
            grid=(4, n_tiles),                                   # (hop stage, row tile)
            in_specs=[
                # adjacency row slab: the only pipelined (streamed) operand
                pl.BlockSpec((tile_n, n_pad), lambda s, t: (t, 0)),
                # constant operands: unblocked -> single VMEM-resident copy each
                pl.BlockSpec(memory_space=vmem_space),           # x0
                pl.BlockSpec(memory_space=vmem_space),           # stacked W1
                pl.BlockSpec(memory_space=vmem_space),           # b1
                pl.BlockSpec(memory_space=vmem_space),           # stacked W2
                pl.BlockSpec(memory_space=vmem_space),           # b2
            ],
            out_specs=pl.BlockSpec((1, c_pad), lambda s, t: (0, 0)),
            scratch_shapes=[
                pltpu.VMEM((n_pad, hop_lanes), jnp.bfloat16),    # hop buffer (x1, then h1)
                pltpu.VMEM((n_pad, h_pad), jnp.bfloat16),        # h (layer-1 output)
                pltpu.VMEM((1, c_pad), jnp.float32),             # node-sum accumulator
            ],
        ),
        compiler_params=pltpu.CompilerParams(
            # Hops depend on the complete previous-hop features -> serial grid.
            dimension_semantics=("arbitrary", "arbitrary"),
            vmem_limit_bytes=int(0.85 * vmem_cap),
        ),
    )(adj_p, x_p, w1s, b1p, w2s, b2p)

    return out[:, :num_classes]


def tagconvn_reference(adj, x, w1, b1, w2, b2):
    """Pure-JAX f32 reference matching DGL TAGConv semantics (k=2)."""
    x1 = adj @ x
    x2 = adj @ x1
    h = jnp.concatenate([x, x1, x2], axis=-1) @ w1.T + b1
    h = jnp.maximum(h, 0.0)
    h1 = adj @ h
    h2 = adj @ h1
    z = jnp.concatenate([h, h1, h2], axis=-1) @ w2.T + b2
    z = jnp.maximum(z, 0.0)
    return jnp.mean(z, axis=0, keepdims=True)


if __name__ == "__main__":
    # Small deterministic synthetic problem (N deliberately not a tile multiple
    # to exercise node padding + masked mean).
    N = 200
    IN_FEATS = 8
    H_FEATS = 32
    NUM_CLASSES = 4

    key = jax.random.PRNGKey(0)
    k_adj, k_x, k_w1, k_b1, k_w2, k_b2 = jax.random.split(key, 6)

    # Random undirected graph (no self loops), symmetric normalization
    # Ahat = D^{-1/2} A D^{-1/2} with degrees clamped to >= 1 (as DGL does).
    upper = (jax.random.uniform(k_adj, (N, N)) < 0.1).astype(jnp.float32)
    a = jnp.triu(upper, k=1)
    a = a + a.T
    deg = jnp.maximum(jnp.sum(a, axis=1), 1.0)
    dinv_sqrt = deg ** -0.5
    adj = dinv_sqrt[:, None] * a * dinv_sqrt[None, :]

    x = jax.random.normal(k_x, (N, IN_FEATS), dtype=jnp.float32)
    w1 = jax.random.normal(k_w1, (H_FEATS, 3 * IN_FEATS), dtype=jnp.float32) * 0.1
    b1 = jax.random.normal(k_b1, (H_FEATS,), dtype=jnp.float32) * 0.1
    w2 = jax.random.normal(k_w2, (NUM_CLASSES, 3 * H_FEATS), dtype=jnp.float32) * 0.1
    b2 = jax.random.normal(k_b2, (NUM_CLASSES,), dtype=jnp.float32) * 0.1

    ref = jax.block_until_ready(tagconvn_reference(adj, x, w1, b1, w2, b2))

    # 1) Adjacency-resident fast path (what small/medium graphs hit).
    out_fast = jax.block_until_ready(tagconvn_forward(adj, x, w1, b1, w2, b2))
    assert out_fast.shape == (1, NUM_CLASSES)
    # bf16 adjacency / features / weights with f32 accumulation -> mixed-precision tol.
    assert jnp.allclose(out_fast, ref, atol=3e-2, rtol=5e-2), (out_fast, ref)

    # 2) Streamed large-graph path (forced; tile_n=128 -> 2 row tiles) for coverage.
    out_str = jax.block_until_ready(
        tagconvn_forward(adj, x, w1, b1, w2, b2, force_streamed=True, tile_n=128))
    assert out_str.shape == (1, NUM_CLASSES)
    assert jnp.allclose(out_str, ref, atol=3e-2, rtol=5e-2), (out_str, ref)

    print("KERNEL_OK")
</pallas_src>

<mosaic_0001>
module attributes {stable_mosaic.version = 11 : i64} {
  func.func @_tagconvn_resident_kernel(%arg0: memref<256x256xbf16, #tpu.memory_space<vmem>>, %arg1: memref<256x128xbf16, #tpu.memory_space<vmem>>, %arg2: memref<384x128xbf16, #tpu.memory_space<vmem>>, %arg3: memref<1x128xf32, #tpu.memory_space<vmem>>, %arg4: memref<384x128xbf16, #tpu.memory_space<vmem>>, %arg5: memref<1x128xf32, #tpu.memory_space<vmem>>, %arg6: memref<1x128xf32, #tpu.memory_space<vmem>>) attributes {dimension_semantics = [], scalar_prefetch = 0 : i64, scratch_operands = 0 : i64, tpu.core_type = #tpu.core_type<tc>} {
    %c0 = arith.constant 0 : index
    %c0_0 = arith.constant 0 : index
    %0 = vector.load %arg0[%c0, %c0_0] : memref<256x256xbf16, #tpu.memory_space<vmem>>, vector<256x256xbf16>
    %c0_1 = arith.constant 0 : index
    %c0_2 = arith.constant 0 : index
    %1 = vector.load %arg1[%c0_1, %c0_2] : memref<256x128xbf16, #tpu.memory_space<vmem>>, vector<256x128xbf16>
    %cst = arith.constant dense<0.000000e+00> : vector<256x128xf32>
    %2 = tpu.matmul %0, %1, %cst {dimension_numbers = #tpu.dot_dimension_numbers<[1], [0], [0], [1], [0, 0, 1, 1], [], []>} : vector<256x256xbf16>, vector<256x128xbf16>, vector<256x128xf32> -> vector<256x128xf32>
    %3 = arith.truncf %2 : vector<256x128xf32> to vector<256x128xbf16>
    %cst_3 = arith.constant dense<0.000000e+00> : vector<256x128xf32>
    %4 = tpu.matmul %0, %3, %cst_3 {dimension_numbers = #tpu.dot_dimension_numbers<[1], [0], [0], [1], [0, 0, 1, 1], [], []>} : vector<256x256xbf16>, vector<256x128xbf16>, vector<256x128xf32> -> vector<256x128xf32>
    %5 = arith.truncf %4 : vector<256x128xf32> to vector<256x128xbf16>
    %c0_4 = arith.constant 0 : index
    %c0_5 = arith.constant 0 : index
    %6 = vector.load %arg2[%c0_4, %c0_5] : memref<384x128xbf16, #tpu.memory_space<vmem>>, vector<128x128xbf16>
    %cst_6 = arith.constant dense<0.000000e+00> : vector<256x128xf32>
    %7 = tpu.matmul %1, %6, %cst_6 {dimension_numbers = #tpu.dot_dimension_numbers<[1], [0], [0], [1], [0, 0, 1, 1], [], []>} : vector<256x128xbf16>, vector<128x128xbf16>, vector<256x128xf32> -> vector<256x128xf32>
    %c128 = arith.constant 128 : index
    %c0_7 = arith.constant 0 : index
    %8 = vector.load %arg2[%c128, %c0_7] : memref<384x128xbf16, #tpu.memory_space<vmem>>, vector<128x128xbf16>
    %cst_8 = arith.constant dense<0.000000e+00> : vector<256x128xf32>
    %9 = tpu.matmul %3, %8, %cst_8 {dimension_numbers = #tpu.dot_dimension_numbers<[1], [0], [0], [1], [0, 0, 1, 1], [], []>} : vector<256x128xbf16>, vector<128x128xbf16>, vector<256x128xf32> -> vector<256x128xf32>
    %10 = arith.addf %7, %9 : vector<256x128xf32>
    %c256 = arith.constant 256 : index
    %c0_9 = arith.constant 0 : index
    %11 = vector.load %arg2[%c256, %c0_9] : memref<384x128xbf16, #tpu.memory_space<vmem>>, vector<128x128xbf16>
    %cst_10 = arith.constant dense<0.000000e+00> : vector<256x128xf32>
    %12 = tpu.matmul %5, %11, %cst_10 {dimension_numbers = #tpu.dot_dimension_numbers<[1], [0], [0], [1], [0, 0, 1, 1], [], []>} : vector<256x128xbf16>, vector<128x128xbf16>, vector<256x128xf32> -> vector<256x128xf32>
    %13 = arith.addf %10, %12 : vector<256x128xf32>
    %c0_11 = arith.constant 0 : index
    %c0_12 = arith.constant 0 : index
    %14 = vector.load %arg3[%c0_11, %c0_12] : memref<1x128xf32, #tpu.memory_space<vmem>>, vector<1x128xf32>
    %15 = vector.broadcast %14 : vector<1x128xf32> to vector<256x128xf32>
    %16 = arith.addf %13, %15 : vector<256x128xf32>
    %cst_13 = arith.constant 0.000000e+00 : f32
    %17 = vector.broadcast %cst_13 : f32 to vector<256x128xf32>
    %18 = arith.maximumf %16, %17 : vector<256x128xf32>
    %19 = arith.truncf %18 : vector<256x128xf32> to vector<256x128xbf16>
    %cst_14 = arith.constant dense<0.000000e+00> : vector<256x128xf32>
    %20 = tpu.matmul %0, %19, %cst_14 {dimension_numbers = #tpu.dot_dimension_numbers<[1], [0], [0], [1], [0, 0, 1, 1], [], []>} : vector<256x256xbf16>, vector<256x128xbf16>, vector<256x128xf32> -> vector<256x128xf32>
    %21 = arith.truncf %20 : vector<256x128xf32> to vector<256x128xbf16>
    %cst_15 = arith.constant dense<0.000000e+00> : vector<256x128xf32>
    %22 = tpu.matmul %0, %21, %cst_15 {dimension_numbers = #tpu.dot_dimension_numbers<[1], [0], [0], [1], [0, 0, 1, 1], [], []>} : vector<256x256xbf16>, vector<256x128xbf16>, vector<256x128xf32> -> vector<256x128xf32>
    %23 = arith.truncf %22 : vector<256x128xf32> to vector<256x128xbf16>
    %c0_16 = arith.constant 0 : index
    %c0_17 = arith.constant 0 : index
    %24 = vector.load %arg4[%c0_16, %c0_17] : memref<384x128xbf16, #tpu.memory_space<vmem>>, vector<128x128xbf16>
    %cst_18 = arith.constant dense<0.000000e+00> : vector<256x128xf32>
    %25 = tpu.matmul %19, %24, %cst_18 {dimension_numbers = #tpu.dot_dimension_numbers<[1], [0], [0], [1], [0, 0, 1, 1], [], []>} : vector<256x128xbf16>, vector<128x128xbf16>, vector<256x128xf32> -> vector<256x128xf32>
    %c128_19 = arith.constant 128 : index
    %c0_20 = arith.constant 0 : index
    %26 = vector.load %arg4[%c128_19, %c0_20] : memref<384x128xbf16, #tpu.memory_space<vmem>>, vector<128x128xbf16>
    %cst_21 = arith.constant dense<0.000000e+00> : vector<256x128xf32>
    %27 = tpu.matmul %21, %26, %cst_21 {dimension_numbers = #tpu.dot_dimension_numbers<[1], [0], [0], [1], [0, 0, 1, 1], [], []>} : vector<256x128xbf16>, vector<128x128xbf16>, vector<256x128xf32> -> vector<256x128xf32>
    %28 = arith.addf %25, %27 : vector<256x128xf32>
    %c256_22 = arith.constant 256 : index
    %c0_23 = arith.constant 0 : index
    %29 = vector.load %arg4[%c256_22, %c0_23] : memref<384x128xbf16, #tpu.memory_space<vmem>>, vector<128x128xbf16>
    %cst_24 = arith.constant dense<0.000000e+00> : vector<256x128xf32>
    %30 = tpu.matmul %23, %29, %cst_24 {dimension_numbers = #tpu.dot_dimension_numbers<[1], [0], [0], [1], [0, 0, 1, 1], [], []>} : vector<256x128xbf16>, vector<128x128xbf16>, vector<256x128xf32> -> vector<256x128xf32>
    %31 = arith.addf %28, %30 : vector<256x128xf32>
    %c0_25 = arith.constant 0 : index
    %c0_26 = arith.constant 0 : index
    %32 = vector.load %arg5[%c0_25, %c0_26] : memref<1x128xf32, #tpu.memory_space<vmem>>, vector<1x128xf32>
    %33 = vector.broadcast %32 : vector<1x128xf32> to vector<256x128xf32>
    %34 = arith.addf %31, %33 : vector<256x128xf32>
    %cst_27 = arith.constant 0.000000e+00 : f32
    %35 = vector.broadcast %cst_27 : f32 to vector<256x128xf32>
    %36 = arith.maximumf %34, %35 : vector<256x128xf32>
    %37 = tpu.iota {dimensions = array<i32: 0>} : vector<256x1xi32>
    %c200_i32 = arith.constant 200 : i32
    %38 = vector.broadcast %c200_i32 : i32 to vector<256x1xi32>
    %39 = arith.cmpi slt, %37, %38 : vector<256x1xi32>
    %40 = arith.extui %39 : vector<256x1xi1> to vector<256x1xi32>
    %41 = arith.sitofp %40 : vector<256x1xi32> to vector<256x1xf32>
    %42 = vector.broadcast %41 : vector<256x1xf32> to vector<256x128xf32>
    %43 = arith.mulf %36, %42 : vector<256x128xf32>
    %cst_28 = arith.constant dense<0.000000e+00> : vector<128xf32>
    %44 = vector.multi_reduction <add>, %43, %cst_28 [0] : vector<256x128xf32> to vector<128xf32>
    %45 = vector.shape_cast %44 : vector<128xf32> to vector<1x128xf32>
    %cst_29 = arith.constant 5.000000e-03 : f32
    %46 = vector.broadcast %cst_29 : f32 to vector<1x128xf32>
    %47 = arith.mulf %45, %46 : vector<1x128xf32>
    %c0_30 = arith.constant 0 : index
    %c0_31 = arith.constant 0 : index
    %48 = vector.load %arg6[%c0_30, %c0_31] : memref<1x128xf32, #tpu.memory_space<vmem>>, vector<1x128xf32>
    tpu.vector_store %arg6[%c0_30, %c0_31], %47 {strides = array<i32>} : memref<1x128xf32, #tpu.memory_space<vmem>>, vector<1x128xf32>,
    return
  }
}

</mosaic_0001>

<bundles_post_ra>
// kernel: tpu_custom_call.1
= control target key start
LH: loop header
LB: loop body
LE: loop exit
PB: predicated region body
PF: predicated region fallthrough
CT: control target
= control target key end

     0   :  { %11 = vsyncpa [#allocation3], 0  ;;  %s4937_s0 = inlined_call_operand.hbm [shape: bf16[256,256], index: 0, kind: input, shape index: {}]   ;;  %s4938_s1 = inlined_call_operand.hbm [shape: bf16[256,128], index: 1, kind: input, shape index: {}]   ;;  %s4939_s2 = inlined_call_operand.hbm [shape: bf16[384,128], index: 2, kind: input, shape index: {}]   ;;  %s4940_s3 = inlined_call_operand.vmem [shape: f32[1,128], index: 3, kind: input, shape index: {}]   ;;  %s4941_s4 = inlined_call_operand.hbm [shape: bf16[384,128], index: 4, kind: input, shape index: {}]   ;;  %s4942_s5 = inlined_call_operand.vmem [shape: f32[1,128], index: 5, kind: input, shape index: {}]   ;;  %s4943_s6 = inlined_call_operand.hbm [shape: f32[1,128], index: 6, kind: output, shape index: {}]  }
   0x1   :  { %12 = vsyncpa [#allocation6], 0 }
   0x2   :  { %13 = vsyncpa [#allocation9], 0 }
   0x3   :  { %14 = vsyncpa [#allocation4], 0  ;;  %s4290_s21 = smov [#allocation5]   ;;  %s4172_s25 = scalar_lea.hbm %s4938_s1, 2048 }
   0x4   :  { %s32_s22 = sshll.u32 %s4290_s21, 4  ;;  %p4173_p0 = scmp.ne.s32.totalorder %s4938_s1, %s4172_s25  ;;  %s33_s22 = int_to_ptr.vmem [resolvable:$true] %s32_s22 }
   0x5   :  { %p4176_p1 = scmp.lt.u32.totalorder %s4172_s25, %s4938_s1 }
   0x7   :  { %p4178_p2 = pnand %p4176_p1, %p4173_p0 }
   0x9   :  { %4181 = shalt.err (!%p4178_p2)
}
   0xa   :  { %s4182_s30 = scalar_lea.vmem %s33_s22, 2048  ;;  %p4187_p4 = scmp.lt.s32.totalorder %s33_s22, %s33_s22 }
   0xb   :  { %p4183_p3 = scmp.ne.s32.totalorder %s33_s22, %s4182_s30  ;;  %p4188_p5 = scmp.lt.s32.totalorder %s4182_s30, %s4182_s30 }
   0xd   :  { %p4189_p6 = por %p4188_p5, %p4187_p4 }
   0xf   :  { %p4190_p7 = pnand %p4189_p6, %p4183_p3 }
  0x11   :  { %4193 = shalt.err (!%p4190_p7)
}
  0x12   :  { %s4291_s7 = smov 64   ;;  %s4292_s8 = smov 4  }
  0x13   :  { %38 = dma.hbm_to_vmem [thread:$0]  %s4938_s1, 2048, %s33_s22, [#allocation6], %s4291_s7, %s4291_s7, %s4292_s8  }
  0x14   :  { %s4293_s11 = smov [#allocation2]   ;;  %s4194_s15 = scalar_lea.hbm %s4937_s0, 4096 }
  0x15   :  { %s20_s12 = sshll.u32 %s4293_s11, 4  ;;  %p4195_p8 = scmp.ne.s32.totalorder %s4937_s0, %s4194_s15  ;;  %s21_s12 = int_to_ptr.vmem [resolvable:$true] %s20_s12 }
  0x16   :  { %p4198_p9 = scmp.lt.u32.totalorder %s4194_s15, %s4937_s0 }
  0x18   :  { %p4200_p10 = pnand %p4198_p9, %p4195_p8 }
  0x1a   :  { %4203 = shalt.err (!%p4200_p10)
}
  0x1b   :  { %s4204_s20 = scalar_lea.vmem %s21_s12, 4096  ;;  %p4209_p12 = scmp.lt.s32.totalorder %s21_s12, %s21_s12 }
  0x1c   :  { %p4205_p11 = scmp.ne.s32.totalorder %s21_s12, %s4204_s20  ;;  %p4210_p13 = scmp.lt.s32.totalorder %s4204_s20, %s4204_s20 }
  0x1e   :  { %p4211_p0 = por %p4210_p13, %p4209_p12 }
  0x20   :  { %p4212_p1 = pnand %p4211_p0, %p4205_p11 }
  0x22   :  { %4215 = shalt.err (!%p4212_p1)
}
  0x23   :  { %s4294_s1 = smov 128   ;;  %s4295_s21 = smov 8  }
  0x24   :  { %26 = dma.hbm_to_vmem [thread:$0]  %s4937_s0, 4096, %s21_s12, [#allocation3], %s4294_s1, %s4294_s1, %s4295_s21  }
  0x25   :  { %s4296_s24 = smov [#allocation7]   ;;  %s4297_s26 = smov [#allocation8]  }
  0x26   :  { %s44_s25 = sshll.u32 %s4296_s24, 4  ;;  %s58_s27 = sshll.u32 %s4297_s26, 4  ;;  %s45_s25 = int_to_ptr.vmem [resolvable:$true] %s44_s25  ;;  %s4361_s27 = int_to_ptr.vmem [resolvable:$true] %s58_s27 }
  0x27   :  { %s4216_s30 = scalar_lea.hbm %s4939_s2, 3072 }
  0x28   :  { %p4217_p2 = scmp.ne.s32.totalorder %s4939_s2, %s4216_s30  ;;  %p4220_p3 = scmp.lt.u32.totalorder %s4216_s30, %s4939_s2 }
  0x2a   :  { %p4222_p4 = pnand %p4220_p3, %p4217_p2 }
  0x2c   :  { %4225 = shalt.err (!%p4222_p4)
}
  0x2d   :  { %s4226_s0 = scalar_lea.vmem %s45_s25, 3072  ;;  %p4231_p6 = scmp.lt.s32.totalorder %s45_s25, %s45_s25 }
  0x2e   :  { %p4227_p5 = scmp.ne.s32.totalorder %s45_s25, %s4226_s0  ;;  %p4232_p7 = scmp.lt.s32.totalorder %s4226_s0, %s4226_s0 }
  0x30   :  { %p4233_p8 = por %p4232_p7, %p4231_p6 }
  0x32   :  { %p4234_p9 = pnand %p4233_p8, %p4227_p5 }
  0x34   :  { %4237 = shalt.err (!%p4234_p9)
}
  0x35   :  { %50 = dma.hbm_to_vmem [thread:$0]  %s4939_s2, 3072, %s45_s25, [#allocation6], %s4291_s7, %s4291_s7, %s4292_s8  }
  0x36   :  { %s4238_s17 = scalar_lea.hbm %s4941_s4, 3072 }
  0x37   :  { %p4239_p10 = scmp.ne.s32.totalorder %s4941_s4, %s4238_s17  ;;  %p4242_p11 = scmp.lt.u32.totalorder %s4238_s17, %s4941_s4 }
  0x39   :  { %p4244_p12 = pnand %p4242_p11, %p4239_p10 }
  0x3b   :  { %4247 = shalt.err (!%p4244_p12)
}
  0x3c   :  { %s4248_s21 = scalar_lea.vmem %s4361_s27, 3072  ;;  %p4253_p0 = scmp.lt.s32.totalorder %s4361_s27, %s4361_s27 }
  0x3d   :  { %p4249_p13 = scmp.ne.s32.totalorder %s4361_s27, %s4248_s21  ;;  %p4254_p1 = scmp.lt.s32.totalorder %s4248_s21, %s4248_s21 }
  0x3f   :  { %p4255_p2 = por %p4254_p1, %p4253_p0 }
  0x41   :  { %p4256_p3 = pnand %p4255_p2, %p4249_p13 }
  0x43   :  { %4259 = shalt.err (!%p4256_p3)
}
  0x44   :  { %64 = dma.hbm_to_vmem [thread:$0]  %s4941_s4, 3072, %s4361_s27, [#allocation9], %s4291_s7, %s4291_s7, %s4292_s8  }
  0x45   :  { %4282 = dma.done.wait [#allocation3], 4096  }
  0x46   :  { %4283 = vsyncadd [#allocation3], 4294963200 }
  0x47   :  { %4284 = dma.done.wait [#allocation6], 5120  }
  0x48   :  { %4285 = vsyncadd [#allocation6], 4294962176 }
  0x49   :  { %4286 = dma.done.wait [#allocation9], 3072  }
  0x4a   :  { %4287 = vsyncadd [#allocation9], 4294964224  ;;  %v4398_v0 = vld [vmem:[#allocation5 + $0x40] sm:$0xff]   ;;  %v4404_v2 = vld [vmem:[#allocation5 + $0x48] sm:$0xff]  }
  0x4b   :  { %v4400_v1 = vld [vmem:[#allocation5] sm:$0xff]   ;;  %2995 = vmatprep.subr.bf16.mxu0 %v4398_v0  ;;  %3875 = vmatprep.subr.bf16.mxu1 %v4398_v0  ;;  %v4408_v3 = vld [vmem:[#allocation5 + $0x8] sm:$0xff]   ;;  %v4412_v4 = vld [vmem:[#allocation5 + $0x50] sm:$0xff]  }
  0x4c   :  { %2996 = vmatpush3.bf16.msra.mxu0 %v4400_v1  ;;  %3883 = vmatpush3.bf16.msra.mxu1 %v4400_v1  ;;  %v4416_v5 = vld [vmem:[#allocation5 + $0x10] sm:$0xff]   ;;  %v4420_v6 = vld [vmem:[#allocation5 + $0x58] sm:$0xff]   ;;  %v4428_v8 = vld [vmem:[#allocation5 + $0x60] sm:$0xff]  }
  0x4d   :  { %2997 = vmatprep.subr.bf16.mxu0 %v4404_v2  ;;  %3876 = vmatprep.subr.bf16.mxu1 %v4404_v2  ;;  %v4424_v7 = vld [vmem:[#allocation5 + $0x18] sm:$0xff]   ;;  %v4430_v9 = vld [vmem:[#allocation5 + $0x20] sm:$0xff]   ;;  %v4434_v10 = vld [vmem:[#allocation5 + $0x68] sm:$0xff]  }
  0x4e   :  { %4964 = vst [vmem:[#allocation15_spill] sm:$0xff] %v4434_v10  ;;  %v4438_v11 = vld [vmem:[#allocation2 + $0x4] ss:$8 sps:$4 sm:$0xff]   ;;  %v4449_v14 = vld [vmem:[#allocation5 + $0x70] sm:$0xff]   ;;  %v4458_v16 = vld [vmem:[#allocation5 + $0x78] sm:$0xff]  }
  0x4f   :  { %4965 = vst [vmem:[#allocation16_spill] sm:$0xff] %v4438_v11  ;;  %v4440_v12 = vld [vmem:[#allocation2 + $0x84] ss:$8 sps:$4 sm:$0xff]   ;;  %432 = vmatprep.mubr.bf16.mxu0 %v4438_v11  ;;  %4966 = vst [vmem:[#allocation17_spill] sm:$0xff] %v4449_v14  ;;  %v4454_v15 = vld [vmem:[#allocation5 + $0x30] sm:$0xff]  }
  0x50   :  { %2998 = vmatpush3.bf16.msra.mxu0 %v4408_v3  ;;  %3884 = vmatpush3.bf16.msra.mxu1 %v4408_v3  ;;  %v4445_v13 = vld [vmem:[#allocation5 + $0x28] sm:$0xff]   ;;  %4967 = vst [vmem:[#allocation18_spill] sm:$0xff] %v4458_v16  ;;  %v4462_v17 = vld [vmem:[#allocation5 + $0x38] sm:$0xff]   ;;  %v4092_v25 = vld [vmem:[#allocation7 + $0x40] sm:$0xff]  }
  0x51   :  { %2999 = vmatprep.subr.bf16.mxu0 %v4412_v4  ;;  %3877 = vmatprep.subr.bf16.mxu1 %v4412_v4  ;;  %v4466_v18 = vld [vmem:[#allocation2] ss:$8 sps:$4 sm:$0xff]   ;;  %v4472_v20 = vld [vmem:[#allocation2 + $0x14] ss:$8 sps:$4 sm:$0xff]   ;;  %v4480_v22 = vld [vmem:[#allocation2 + $0x10] ss:$8 sps:$4 sm:$0xff]  }
  0x52   :  { %496 = vmatprep.mubr.bf16.mxu1 %v4440_v12  ;;  %v4468_v19 = vld [vmem:[#allocation2 + $0x80] ss:$8 sps:$4 sm:$0xff]   ;;  %v4474_v21 = vld [vmem:[#allocation2 + $0x94] ss:$8 sps:$4 sm:$0xff]   ;;  %v4482_v23 = vld [vmem:[#allocation2 + $0x90] ss:$8 sps:$4 sm:$0xff]  }
  0x53   :  { %v4484_v24 = vld [vmem:[#allocation2 + $0x24] ss:$8 sps:$4 sm:$0xff]   ;;  %v4094_v28 = vld [vmem:[#allocation7 + $0x50] sm:$0xff]   ;;  %v4492_v29 = vld [vmem:[#allocation2 + $0x20] ss:$8 sps:$4 sm:$0xff]  }
  0x54   :  { %3000 = vmatpush3.bf16.msra.mxu0 %v4416_v5  ;;  %3885 = vmatpush3.bf16.msra.mxu1 %v4416_v5  ;;  %v4486_v26 = vld [vmem:[#allocation2 + $0xa4] ss:$8 sps:$4 sm:$0xff]   ;;  %v4494_v30 = vld [vmem:[#allocation2 + $0xa0] ss:$8 sps:$4 sm:$0xff]   ;;  %v4496_v31 = vld [vmem:[#allocation2 + $0x34] ss:$8 sps:$4 sm:$0xff]  }
  0x55   :  { %3001 = vmatprep.subr.bf16.mxu0 %v4420_v6  ;;  %3878 = vmatprep.subr.bf16.mxu1 %v4420_v6  ;;  %v4093_v27 = vld [vmem:[#allocation7 + $0x48] sm:$0xff]   ;;  %v4498_v32 = vld [vmem:[#allocation2 + $0xb4] ss:$8 sps:$4 sm:$0xff]   ;;  %v4504_v34 = vld [vmem:[#allocation2 + $0x30] ss:$8 sps:$4 sm:$0xff]  }
  0x56   :  { %v4095_v33 = vld [vmem:[#allocation7 + $0x58] sm:$0xff]   ;;  %v4508_v36 = vld [vmem:[#allocation2 + $0x44] ss:$8 sps:$4 sm:$0xff]   ;;  %v4516_v38 = vld [vmem:[#allocation2 + $0x40] ss:$8 sps:$4 sm:$0xff]  }
  0x57   :  { %v4506_v35 = vld [vmem:[#allocation2 + $0xb0] ss:$8 sps:$4 sm:$0xff]   ;;  %v4510_v37 = vld [vmem:[#allocation2 + $0xc4] ss:$8 sps:$4 sm:$0xff]   ;;  %v4518_v39 = vld [vmem:[#allocation2 + $0xc0] ss:$8 sps:$4 sm:$0xff]  }
  0x58   :  { %3002 = vmatpush3.bf16.msra.mxu0 %v4424_v7  ;;  %3886 = vmatpush3.bf16.msra.mxu1 %v4424_v7  ;;  %4968 = vst [vmem:[#allocation19_spill] sm:$0xff] %v4506_v35  ;;  %4969 = vst [vmem:[#allocation20_spill] sm:$0xff] %v4510_v37  ;;  %v4520_v40 = vld [vmem:[#allocation2 + $0x54] ss:$8 sps:$4 sm:$0xff]   ;;  %v4528_v42 = vld [vmem:[#allocation2 + $0x50] ss:$8 sps:$4 sm:$0xff]  }
  0x59   :  { %3003 = vmatprep.subr.bf16.mxu0 %v4428_v8  ;;  %3879 = vmatprep.subr.bf16.mxu1 %v4428_v8  ;;  %4970 = vst [vmem:[#allocation21_spill] sm:$0xff] %v4518_v39  ;;  %v4522_v41 = vld [vmem:[#allocation2 + $0xd4] ss:$8 sps:$4 sm:$0xff]   ;;  %v4530_v43 = vld [vmem:[#allocation2 + $0xd0] ss:$8 sps:$4 sm:$0xff]   ;;  %v4096_v52 = vld [vmem:[#allocation7 + $0x60] sm:$0xff]  }
  0x5a   :  { %4971 = vst [vmem:[#allocation22_spill] sm:$0xff] %v4522_v41  ;;  %4972 = vst [vmem:[#allocation23_spill] sm:$0xff] %v4530_v43  ;;  %v4532_v44 = vld [vmem:[#allocation2 + $0x64] ss:$8 sps:$4 sm:$0xff]   ;;  %v4540_v46 = vld [vmem:[#allocation2 + $0x60] ss:$8 sps:$4 sm:$0xff]  }
  0x5b   :  { %v4534_v45 = vld [vmem:[#allocation2 + $0xe4] ss:$8 sps:$4 sm:$0xff]   ;;  %v4542_v47 = vld [vmem:[#allocation2 + $0xe0] ss:$8 sps:$4 sm:$0xff]   ;;  %v4544_v48 = vld [vmem:[#allocation2 + $0x74] ss:$8 sps:$4 sm:$0xff]  }
  0x5c   :  { %3004 = vmatpush3.bf16.msra.mxu0 %v4430_v9  ;;  %3887 = vmatpush3.bf16.msra.mxu1 %v4430_v9  ;;  %4973 = vst [vmem:[#allocation24_spill] sm:$0xff] %v4534_v45  ;;  %4974 = vst [vmem:[#allocation25_spill] sm:$0xff] %v4542_v47  ;;  %v4546_v49 = vld [vmem:[#allocation2 + $0xf4] ss:$8 sps:$4 sm:$0xff]   ;;  %v4552_v50 = vld [vmem:[#allocation2 + $0x70] ss:$8 sps:$4 sm:$0xff]  }
  0x5d   :  { %3005 = vmatprep.subr.bf16.mxu0 %v4434_v10  ;;  %3880 = vmatprep.subr.bf16.mxu1 %v4434_v10  ;;  %4975 = vst [vmem:[#allocation26_spill] sm:$0xff] %v4546_v49  ;;  %v4554_v51 = vld [vmem:[#allocation2 + $0xf0] ss:$8 sps:$4 sm:$0xff]   ;;  %v4097_v53 = vld [vmem:[#allocation7 + $0x68] sm:$0xff]   ;;  %v4100_v10 = vld [vmem:[#allocation7] sm:$0xff]  }
  0x5e   :  { %4976 = vst [vmem:[#allocation27_spill] sm:$0xff] %v4554_v51  ;;  %v4098_v54 = vld [vmem:[#allocation7 + $0x70] sm:$0xff]   ;;  %v4099_v55 = vld [vmem:[#allocation7 + $0x78] sm:$0xff]  }
  0x60   :  { %3006 = vmatpush3.bf16.msra.mxu0 %v4445_v13  ;;  %3888 = vmatpush3.bf16.msra.mxu1 %v4445_v13 }
  0x61   :  { %3007 = vmatprep.subr.bf16.mxu0 %v4449_v14  ;;  %3881 = vmatprep.subr.bf16.mxu1 %v4449_v14 }
  0x64   :  { %3008 = vmatpush3.bf16.msra.mxu0 %v4454_v15  ;;  %3889 = vmatpush3.bf16.msra.mxu1 %v4454_v15 }
  0x65   :  { %3009 = vmatprep.subr.bf16.mxu0 %v4458_v16  ;;  %3882 = vmatprep.subr.bf16.mxu1 %v4458_v16 }
  0x68   :  { %3010 = vmatpush3.bf16.msra.mxu0 %v4462_v17  ;;  %3890 = vmatpush3.bf16.msra.mxu1 %v4462_v17 }
  0x69   :  { %3587 = vmatprep.subr.bf16.mxu0 %v4092_v25 }
  0x6b   :  { %433 = vmatmul.mubr.bf16.vlgmr.msra.gmra.mrb[0].mxu0 %v4466_v18  ;;  %497 = vmatmul.mubr.bf16.vlgmr.msra.gmra.mrb[0].mxu1 %v4468_v19 }
  0x6c   :  { %440 = vmatprep.mubr.bf16.mxu0 %v4472_v20  ;;  %504 = vmatprep.mubr.bf16.mxu1 %v4474_v21 }
  0x6d   :  { %3588 = vmatpush3.bf16.msra.mxu0 %v4092_v25 }
  0x6e   :  { %3589 = vmatprep.subr.bf16.mxu0 %v4093_v27 }
  0x71   :  { %3590 = vmatpush3.bf16.msra.mxu0 %v4093_v27 }
  0x72   :  { %3591 = vmatprep.subr.bf16.mxu0 %v4094_v28 }
  0x73   :  { %441 = vmatmul.mubr.bf16.gmra.mrb[4].mxu0 %v4480_v22  ;;  %505 = vmatmul.mubr.bf16.gmra.mrb[4].mxu1 %v4482_v23 }
  0x74   :  { %448 = vmatprep.mubr.bf16.mxu0 %v4484_v24  ;;  %512 = vmatprep.mubr.bf16.mxu1 %v4486_v26 }
  0x75   :  { %3592 = vmatpush3.bf16.msra.mxu0 %v4094_v28 }
  0x76   :  { %3593 = vmatprep.subr.bf16.mxu0 %v4095_v33 }
  0x79   :  { %3594 = vmatpush3.bf16.msra.mxu0 %v4095_v33 }
  0x7a   :  { %3595 = vmatprep.subr.bf16.mxu0 %v4096_v52 }
  0x7b   :  { %449 = vmatmul.mubr.bf16.gmra.mrb[8].mxu0 %v4492_v29  ;;  %513 = vmatmul.mubr.bf16.gmra.mrb[8].mxu1 %v4494_v30 }
  0x7c   :  { %456 = vmatprep.mubr.bf16.mxu0 %v4496_v31  ;;  %520 = vmatprep.mubr.bf16.mxu1 %v4498_v32 }
  0x7d   :  { %3596 = vmatpush3.bf16.msra.mxu0 %v4096_v52 }
  0x7e   :  { %3597 = vmatprep.subr.bf16.mxu0 %v4097_v53 }
  0x81   :  { %3598 = vmatpush3.bf16.msra.mxu0 %v4097_v53 }
  0x82   :  { %3599 = vmatprep.subr.bf16.mxu0 %v4098_v54 }
  0x83   :  { %457 = vmatmul.mubr.bf16.gmra.mrb[12].mxu0 %v4504_v34  ;;  %521 = vmatmul.mubr.bf16.gmra.mrb[12].mxu1 %v4506_v35 }
  0x84   :  { %464 = vmatprep.mubr.bf16.mxu0 %v4508_v36  ;;  %528 = vmatprep.mubr.bf16.mxu1 %v4510_v37 }
  0x85   :  { %3600 = vmatpush3.bf16.msra.mxu0 %v4098_v54 }
  0x86   :  { %3601 = vmatprep.subr.bf16.mxu0 %v4099_v55 }
  0x89   :  { %3602 = vmatpush3.bf16.msra.mxu0 %v4099_v55 }
  0x8a   :  { %3635 = vmatprep.subr.bf16.mxu0 %v4100_v10 }
  0x8b   :  { %465 = vmatmul.mubr.bf16.gmra.mrb[16].mxu0 %v4516_v38  ;;  %529 = vmatmul.mubr.bf16.gmra.mrb[16].mxu1 %v4518_v39 }
  0x8c   :  { %472 = vmatprep.mubr.bf16.mxu0 %v4520_v40  ;;  %536 = vmatprep.mubr.bf16.mxu1 %v4522_v41 }
  0x93   :  { %473 = vmatmul.mubr.bf16.gmra.mrb[20].mxu0 %v4528_v42  ;;  %537 = vmatmul.mubr.bf16.gmra.mrb[20].mxu1 %v4530_v43 }
  0x94   :  { %480 = vmatprep.mubr.bf16.mxu0 %v4532_v44  ;;  %544 = vmatprep.mubr.bf16.mxu1 %v4534_v45 }
  0x9b   :  { %481 = vmatmul.mubr.bf16.gmra.mrb[24].mxu0 %v4540_v46  ;;  %545 = vmatmul.mubr.bf16.gmra.mrb[24].mxu1 %v4542_v47 }
  0x9c   :  { %488 = vmatprep.mubr.bf16.mxu0 %v4544_v48  ;;  %552 = vmatprep.mubr.bf16.mxu1 %v4546_v49 }
  0xa3   :  { %489 = vmatmul.mubr.bf16.gmra.mrb[28].mxu0 %v4552_v50  ;;  %553 = vmatmul.mubr.bf16.gmra.mrb[28].mxu1 %v4554_v51 }
  0xa4   :  { %609 = vmatprep.mubr.bf16.mxu1 %v4438_v11 }
 0x13e   :  { %v3011_v56 = vpop.f32.mrb[0].mxu0  ;;  %v3059_v57 = vpop.f32.mrb[0].mxu1 }
 0x13f   :  { %v3012_v58 = vpop.f32.mrb[1].mxu0  ;;  %v3060_v59 = vpop.f32.mrb[1].mxu1 }
 0x140   :  { %v3013_v60 = vadd.f32 %v3012_v58, %v3011_v56  ;;  %v3061_v61 = vadd.f32 %v3060_v59, %v3059_v57  ;;  %v3014_v62 = vpop.f32.mrb[2].mxu0  ;;  %v3062_v63 = vpop.f32.mrb[2].mxu1 }
 0x141   :  { %v3015_v25 = vpop.f32.mrb[3].mxu0  ;;  %v3063_v27 = vpop.f32.mrb[3].mxu1 }
 0x142   :  { %v3016_v28 = vadd.f32 %v3015_v25, %v3014_v62  ;;  %v3064_v33 = vadd.f32 %v3063_v27, %v3062_v63 }
 0x144   :  { %v561_v52 = vpack.c.bf16 %v3016_v28, %v3013_v60  ;;  %v4559_v53 = vpack.c.bf16 %v3064_v33, %v3061_v61 }
 0x146   :  { %v3017_v11 = vpop.f32.mrb[4].mxu0  ;;  %v3065_v54 = vpop.f32.mrb[4].mxu1  ;;  %3107 = vmatprep.subr.bf16.mxu1 %v4559_v53  ;;  %3603 = vmatprep.mubr.bf16.mxu0 %v561_v52 }
 0x147   :  { %v3018_v55 = vpop.f32.mrb[5].mxu0  ;;  %v3066_v51 = vpop.f32.mrb[5].mxu1  ;;  %3108 = vmatpush3.bf16.msra.mxu1 %v561_v52 }
 0x148   :  { %v3019_v49 = vadd.f32 %v3018_v55, %v3017_v11  ;;  %v3067_v56 = vadd.f32 %v3066_v51, %v3065_v54  ;;  %v3020_v57 = vpop.f32.mrb[6].mxu0  ;;  %v3068_v58 = vpop.f32.mrb[6].mxu1 }
 0x149   :  { %v3021_v59 = vpop.f32.mrb[7].mxu0  ;;  %v3069_v47 = vpop.f32.mrb[7].mxu1 }
 0x14a   :  { %v3022_v45 = vadd.f32 %v3021_v59, %v3020_v57  ;;  %v3070_v62 = vadd.f32 %v3069_v47, %v3068_v58 }
 0x14c   :  { %v562_v63 = vpack.c.bf16 %v3022_v45, %v3019_v49  ;;  %v4562_v60 = vpack.c.bf16 %v3070_v62, %v3067_v56 }
 0x14e   :  { %v3023_v61 = vpop.f32.mrb[8].mxu0  ;;  %v3071_v25 = vpop.f32.mrb[8].mxu1  ;;  %3109 = vmatprep.subr.bf16.mxu1 %v4562_v60  ;;  %3604 = vmatmul.mubr.bf16.vlgmr.msra.gmra.mrb[32].mxu0 %v562_v63 }
 0x14f   :  { %v3024_v27 = vpop.f32.mrb[9].mxu0  ;;  %v3072_v28 = vpop.f32.mrb[9].mxu1  ;;  %3110 = vmatpush3.bf16.msra.mxu1 %v562_v63  ;;  %3636 = vmatpush3.bf16.msra.mxu0 %v4100_v10  ;;  %v4105_v10 = vld [vmem:[#allocation7 + $0x28] sm:$0xff]  }
 0x150   :  { %v3025_v33 = vadd.f32 %v3024_v27, %v3023_v61  ;;  %v3073_v11 = vadd.f32 %v3072_v28, %v3071_v25  ;;  %v3026_v51 = vpop.f32.mrb[10].mxu0  ;;  %v3074_v52 = vpop.f32.mrb[10].mxu1 }
 0x151   :  { %v3027_v54 = vpop.f32.mrb[11].mxu0  ;;  %v3075_v55 = vpop.f32.mrb[11].mxu1 }
 0x152   :  { %v3028_v43 = vadd.f32 %v3027_v54, %v3026_v51  ;;  %v3076_v57 = vadd.f32 %v3075_v55, %v3074_v52 }
 0x154   :  { %v563_v47 = vpack.c.bf16 %v3028_v43, %v3025_v33  ;;  %v4565_v45 = vpack.c.bf16 %v3076_v57, %v3073_v11 }
 0x156   :  { %v3029_v49 = vpop.f32.mrb[12].mxu0  ;;  %v3077_v56 = vpop.f32.mrb[12].mxu1  ;;  %3111 = vmatprep.subr.bf16.mxu1 %v4565_v45  ;;  %3607 = vmatprep.mubr.bf16.mxu0 %v563_v47 }
 0x157   :  { %v3030_v58 = vpop.f32.mrb[13].mxu0  ;;  %v3078_v59 = vpop.f32.mrb[13].mxu1  ;;  %3112 = vmatpush3.bf16.msra.mxu1 %v563_v47 }
 0x158   :  { %v3031_v62 = vadd.f32 %v3030_v58, %v3029_v49  ;;  %v3079_v63 = vadd.f32 %v3078_v59, %v3077_v56  ;;  %v3032_v61 = vpop.f32.mrb[14].mxu0  ;;  %v3080_v25 = vpop.f32.mrb[14].mxu1 }
 0x159   :  { %v3033_v27 = vpop.f32.mrb[15].mxu0  ;;  %v3081_v28 = vpop.f32.mrb[15].mxu1 }
 0x15a   :  { %v3034_v41 = vadd.f32 %v3033_v27, %v3032_v61  ;;  %v3082_v51 = vadd.f32 %v3081_v28, %v3080_v25 }
 0x15c   :  { %v564_v52 = vpack.c.bf16 %v3034_v41, %v3031_v62  ;;  %v4568_v43 = vpack.c.bf16 %v3082_v51, %v3079_v63 }
 0x15e   :  { %v3035_v33 = vpop.f32.mrb[16].mxu0  ;;  %v3083_v11 = vpop.f32.mrb[16].mxu1  ;;  %3113 = vmatprep.subr.bf16.mxu1 %v4568_v43  ;;  %3608 = vmatmul.mubr.bf16.gmra.mrb[36].mxu0 %v564_v52 }
 0x15f   :  { %v3036_v54 = vpop.f32.mrb[17].mxu0  ;;  %v3084_v55 = vpop.f32.mrb[17].mxu1  ;;  %3114 = vmatpush3.bf16.msra.mxu1 %v564_v52 }
 0x160   :  { %v3037_v57 = vadd.f32 %v3036_v54, %v3035_v33  ;;  %v3085_v47 = vadd.f32 %v3084_v55, %v3083_v11  ;;  %v3038_v49 = vpop.f32.mrb[18].mxu0  ;;  %v3086_v56 = vpop.f32.mrb[18].mxu1 }
 0x161   :  { %v3039_v58 = vpop.f32.mrb[19].mxu0  ;;  %v3087_v59 = vpop.f32.mrb[19].mxu1 }
 0x162   :  { %v3040_v39 = vadd.f32 %v3039_v58, %v3038_v49  ;;  %v3088_v61 = vadd.f32 %v3087_v59, %v3086_v56 }
 0x164   :  { %v565_v25 = vpack.c.bf16 %v3040_v39, %v3037_v57  ;;  %v4571_v41 = vpack.c.bf16 %v3088_v61, %v3085_v47 }
 0x166   :  { %v3041_v62 = vpop.f32.mrb[20].mxu0  ;;  %v3089_v63 = vpop.f32.mrb[20].mxu1  ;;  %3115 = vmatprep.subr.bf16.mxu1 %v4571_v41  ;;  %3611 = vmatprep.mubr.bf16.mxu0 %v565_v25 }
 0x167   :  { %v3042_v27 = vpop.f32.mrb[21].mxu0  ;;  %v3090_v28 = vpop.f32.mrb[21].mxu1  ;;  %3116 = vmatpush3.bf16.msra.mxu1 %v565_v25 }
 0x168   :  { %v3043_v51 = vadd.f32 %v3042_v27, %v3041_v62  ;;  %v3091_v52 = vadd.f32 %v3090_v28, %v3089_v63  ;;  %v3044_v33 = vpop.f32.mrb[22].mxu0  ;;  %v3092_v11 = vpop.f32.mrb[22].mxu1 }
 0x169   :  { %v3045_v54 = vpop.f32.mrb[23].mxu0  ;;  %v3093_v55 = vpop.f32.mrb[23].mxu1 }
 0x16a   :  { %v3046_v16 = vadd.f32 %v3045_v54, %v3044_v33  ;;  %v3094_v49 = vadd.f32 %v3093_v55, %v3092_v11 }
 0x16c   :  { %v566_v56 = vpack.c.bf16 %v3046_v16, %v3043_v51  ;;  %v4574_v39 = vpack.c.bf16 %v3094_v49, %v3091_v52 }
 0x16e   :  { %v3047_v57 = vpop.f32.mrb[24].mxu0  ;;  %v3095_v47 = vpop.f32.mrb[24].mxu1  ;;  %3117 = vmatprep.subr.bf16.mxu1 %v4574_v39  ;;  %3612 = vmatmul.mubr.bf16.gmra.mrb[40].mxu0 %v566_v56 }
 0x16f   :  { %v3048_v58 = vpop.f32.mrb[25].mxu0  ;;  %v3096_v59 = vpop.f32.mrb[25].mxu1  ;;  %3118 = vmatpush3.bf16.msra.mxu1 %v566_v56 }
 0x170   :  { %v3049_v61 = vadd.f32 %v3048_v58, %v3047_v57  ;;  %v3097_v25 = vadd.f32 %v3096_v59, %v3095_v47  ;;  %v3050_v62 = vpop.f32.mrb[26].mxu0  ;;  %v3098_v63 = vpop.f32.mrb[26].mxu1 }
 0x171   :  { %v3051_v27 = vpop.f32.mrb[27].mxu0  ;;  %v3099_v28 = vpop.f32.mrb[27].mxu1 }
 0x172   :  { %v3052_v37 = vadd.f32 %v3051_v27, %v3050_v62  ;;  %v3100_v33 = vadd.f32 %v3099_v28, %v3098_v63 }
 0x174   :  { %v567_v11 = vpack.c.bf16 %v3052_v37, %v3049_v61  ;;  %v575_v16 = vpack.c.bf16 %v3100_v33, %v3097_v25  ;;  %v4101_v37 = vld [vmem:[#allocation7 + $0x8] sm:$0xff]   ;;  %v4102_v61 = vld [vmem:[#allocation7 + $0x10] sm:$0xff]   ;;  %v4103_v25 = vld [vmem:[#allocation7 + $0x18] sm:$0xff]  }
 0x175   :  { %3637 = vmatprep.subr.bf16.mxu0 %v4101_v37 }
 0x176   :  { %v3053_v51 = vpop.f32.mrb[28].mxu0  ;;  %v3101_v52 = vpop.f32.mrb[28].mxu1  ;;  %3119 = vmatprep.subr.bf16.mxu1 %v575_v16  ;;  %3615 = vmatprep.mubr.bf16.mxu0 %v567_v11 }
 0x177   :  { %v3054_v54 = vpop.f32.mrb[29].mxu0  ;;  %v3102_v55 = vpop.f32.mrb[29].mxu1  ;;  %3120 = vmatpush3.bf16.msra.mxu1 %v567_v11  ;;  %3638 = vmatpush3.bf16.msra.mxu0 %v4101_v37 }
 0x178   :  { %v3055_v49 = vadd.f32 %v3054_v54, %v3053_v51  ;;  %v3103_v35 = vadd.f32 %v3102_v55, %v3101_v52  ;;  %v3056_v56 = vpop.f32.mrb[30].mxu0  ;;  %v3104_v57 = vpop.f32.mrb[30].mxu1  ;;  %3639 = vmatprep.subr.bf16.mxu0 %v4102_v61 }
 0x179   :  { %v3057_v47 = vpop.f32.mrb[31].mxu0  ;;  %v3105_v58 = vpop.f32.mrb[31].mxu1 }
 0x17a   :  { %v3058_v59 = vadd.f32 %v3057_v47, %v3056_v56  ;;  %v3106_v14 = vadd.f32 %v3105_v58, %v3104_v57 }
 0x17b   :  { %3640 = vmatpush3.bf16.msra.mxu0 %v4102_v61 }
 0x17c   :  { %v568_v62 = vpack.c.bf16 %v3058_v59, %v3055_v49  ;;  %v576_v63 = vpack.c.bf16 %v3106_v14, %v3103_v35  ;;  %3641 = vmatprep.subr.bf16.mxu0 %v4103_v25  ;;  %v4104_v14 = vld [vmem:[#allocation7 + $0x20] sm:$0xff]  }
 0x17e   :  { %3121 = vmatprep.subr.bf16.mxu1 %v576_v63  ;;  %3616 = vmatmul.mubr.bf16.gmra.mrb[44].mxu0 %v568_v62 }
 0x17f   :  { %3122 = vmatpush3.bf16.msra.mxu1 %v568_v62  ;;  %3619 = vmatprep.mubr.bf16.mxu0 %v4559_v53 }
 0x180   :  { %3642 = vmatpush3.bf16.msra.mxu0 %v4103_v25 }
 0x181   :  { %3643 = vmatprep.subr.bf16.mxu0 %v4104_v14 }
 0x182   :  { %610 = vmatmul.mubr.bf16.vlgmr.msra.gmra.mrb[32].mxu1 %v4466_v18  ;;  %v4106_v18 = vld [vmem:[#allocation7 + $0x30] sm:$0xff]  }
 0x183   :  { %617 = vmatprep.mubr.bf16.mxu1 %v4472_v20  ;;  %v4107_v20 = vld [vmem:[#allocation7 + $0x38] sm:$0xff]  }
 0x184   :  { %3644 = vmatpush3.bf16.msra.mxu0 %v4104_v14 }
 0x185   :  { %3645 = vmatprep.subr.bf16.mxu0 %v4105_v10 }
 0x186   :  { %3620 = vmatmul.mubr.bf16.gmra.mrb[48].mxu0 %v4562_v60 }
 0x187   :  { %3623 = vmatprep.mubr.bf16.mxu0 %v4565_v45 }
 0x188   :  { %3646 = vmatpush3.bf16.msra.mxu0 %v4105_v10 }
 0x189   :  { %3647 = vmatprep.subr.bf16.mxu0 %v4106_v18 }
 0x18a   :  { %618 = vmatmul.mubr.bf16.gmra.mrb[36].mxu1 %v4480_v22  ;;  %v4108_v22 = vld [vmem:[#allocation7 + $0x80] sm:$0xff]  }
 0x18b   :  { %625 = vmatprep.mubr.bf16.mxu1 %v4484_v24  ;;  %v4109_v24 = vld [vmem:[#allocation7 + $0x88] sm:$0xff]  }
 0x18c   :  { %3648 = vmatpush3.bf16.msra.mxu0 %v4106_v18 }
 0x18d   :  { %3649 = vmatprep.subr.bf16.mxu0 %v4107_v20 }
 0x18e   :  { %3624 = vmatmul.mubr.bf16.gmra.mrb[52].mxu0 %v4568_v43 }
 0x18f   :  { %3627 = vmatprep.mubr.bf16.mxu0 %v4571_v41 }
 0x190   :  { %3650 = vmatpush3.bf16.msra.mxu0 %v4107_v20 }
 0x191   :  { %3683 = vmatprep.subr.bf16.mxu0 %v4108_v22 }
 0x192   :  { %626 = vmatmul.mubr.bf16.gmra.mrb[40].mxu1 %v4492_v29  ;;  %v4110_v29 = vld [vmem:[#allocation7 + $0x90] sm:$0xff]  }
 0x193   :  { %633 = vmatprep.mubr.bf16.mxu1 %v4496_v31  ;;  %v4111_v31 = vld [vmem:[#allocation7 + $0x98] sm:$0xff]  }
 0x196   :  { %3628 = vmatmul.mubr.bf16.gmra.mrb[56].mxu0 %v4574_v39 }
 0x197   :  { %3631 = vmatprep.mubr.bf16.mxu0 %v575_v16 }
 0x19a   :  { %634 = vmatmul.mubr.bf16.gmra.mrb[44].mxu1 %v4504_v34 }
 0x19b   :  { %641 = vmatprep.mubr.bf16.mxu1 %v4508_v36 }
 0x19e   :  { %3632 = vmatmul.mubr.bf16.gmra.mrb[60].mxu0 %v576_v63 }
 0x19f   :  { %3651 = vmatprep.mubr.bf16.mxu0 %v4400_v1  ;;  %v4977_v1 = vld [vmem:[#allocation15_spill] sm:$0xff] }
 0x1a2   :  { %642 = vmatmul.mubr.bf16.gmra.mrb[48].mxu1 %v4516_v38 }
 0x1a3   :  { %649 = vmatprep.mubr.bf16.mxu1 %v4520_v40 }
 0x1a6   :  { %3652 = vmatmul.mubr.bf16.vlgmr.msra.gmra.mrb[32].mxu0 %v4408_v3  ;;  %v4978_v3 = vld [vmem:[#allocation17_spill] sm:$0xff] }
 0x1a7   :  { %3655 = vmatprep.mubr.bf16.mxu0 %v4416_v5  ;;  %3684 = vmatpush3.bf16.msra.mxu0 %v4108_v22  ;;  %v4980_v5 = vld [vmem:[#allocation20_spill] sm:$0xff] }
 0x1a8   :  { %3685 = vmatprep.subr.bf16.mxu0 %v4109_v24 }
 0x1aa   :  { %650 = vmatmul.mubr.bf16.gmra.mrb[52].mxu1 %v4528_v42 }
 0x1ab   :  { %657 = vmatprep.mubr.bf16.mxu1 %v4532_v44  ;;  %3686 = vmatpush3.bf16.msra.mxu0 %v4109_v24 }
 0x1ac   :  { %3687 = vmatprep.subr.bf16.mxu0 %v4110_v29 }
 0x1ae   :  { %3656 = vmatmul.mubr.bf16.gmra.mrb[36].mxu0 %v4424_v7  ;;  %v4981_v7 = vld [vmem:[#allocation18_spill] sm:$0xff] }
 0x1af   :  { %3659 = vmatprep.mubr.bf16.mxu0 %v4430_v9  ;;  %3688 = vmatpush3.bf16.msra.mxu0 %v4110_v29  ;;  %v4982_v9 = vld [vmem:[#allocation21_spill] sm:$0xff] }
 0x1b0   :  { %3689 = vmatprep.subr.bf16.mxu0 %v4111_v31 }
 0x1b2   :  { %658 = vmatmul.mubr.bf16.gmra.mrb[56].mxu1 %v4540_v46 }
 0x1b3   :  { %665 = vmatprep.mubr.bf16.mxu1 %v4544_v48  ;;  %3690 = vmatpush3.bf16.msra.mxu0 %v4111_v31 }
 0x1b6   :  { %3660 = vmatmul.mubr.bf16.gmra.mrb[40].mxu0 %v4445_v13  ;;  %v4984_v13 = vld [vmem:[#allocation23_spill] sm:$0xff] }
 0x1b7   :  { %3663 = vmatprep.mubr.bf16.mxu0 %v4454_v15  ;;  %v4985_v15 = vld [vmem:[#allocation24_spill] sm:$0xff] }
 0x1ba   :  { %666 = vmatmul.mubr.bf16.gmra.mrb[60].mxu1 %v4552_v50 }
 0x1bb   :  { %673 = vmatprep.mubr.bf16.mxu1 %v4440_v12  ;;  %v4983_v12 = vld [vmem:[#allocation22_spill] sm:$0xff] }
 0x1be   :  { %3664 = vmatmul.mubr.bf16.gmra.mrb[44].mxu0 %v4462_v17  ;;  %v4986_v17 = vld [vmem:[#allocation25_spill] sm:$0xff] }
 0x1bf   :  { %3667 = vmatprep.mubr.bf16.mxu0 %v4398_v0  ;;  %v4112_v0 = vld [vmem:[#allocation7 + $0xa0] sm:$0xff]  }
 0x1c0   :  { %3691 = vmatprep.subr.bf16.mxu0 %v4112_v0 }
 0x1c1   :  { %3692 = vmatpush3.bf16.msra.mxu0 %v4112_v0 }
 0x1c2   :  { %674 = vmatmul.mubr.bf16.gmra.mrb[64].mxu1 %v4468_v19  ;;  %v4987_v19 = vld [vmem:[#allocation26_spill] sm:$0xff] }
 0x1c3   :  { %681 = vmatprep.mubr.bf16.mxu1 %v4474_v21  ;;  %v4988_v21 = vld [vmem:[#allocation27_spill] sm:$0xff] }
 0x1c6   :  { %3668 = vmatmul.mubr.bf16.gmra.mrb[48].mxu0 %v4404_v2  ;;  %v4113_v2 = vld [vmem:[#allocation7 + $0xa8] sm:$0xff]  }
 0x1c7   :  { %3671 = vmatprep.mubr.bf16.mxu0 %v4412_v4  ;;  %3693 = vmatprep.subr.bf16.mxu0 %v4113_v2  ;;  %v4979_v4 = vld [vmem:[#allocation19_spill] sm:$0xff] }
 0x1c8   :  { %3694 = vmatpush3.bf16.msra.mxu0 %v4113_v2 }
 0x1ca   :  { %682 = vmatmul.mubr.bf16.gmra.mrb[68].mxu1 %v4482_v23  ;;  %v4989_v23 = vld [vmem:[#allocation16_spill] sm:$0xff] }
 0x1cb   :  { %689 = vmatprep.mubr.bf16.mxu1 %v4486_v26 }
 0x1ce   :  { %3672 = vmatmul.mubr.bf16.gmra.mrb[52].mxu0 %v4420_v6  ;;  %v4114_v6 = vld [vmem:[#allocation7 + $0xb0] sm:$0xff]  }
 0x1cf   :  { %3675 = vmatprep.mubr.bf16.mxu0 %v4428_v8  ;;  %3695 = vmatprep.subr.bf16.mxu0 %v4114_v6  ;;  %v4115_v8 = vld [vmem:[#allocation7 + $0xb8] sm:$0xff]  }
 0x1d0   :  { %3696 = vmatpush3.bf16.msra.mxu0 %v4114_v6 }
 0x1d1   :  { %3697 = vmatprep.subr.bf16.mxu0 %v4115_v8 }
 0x1d2   :  { %690 = vmatmul.mubr.bf16.gmra.mrb[72].mxu1 %v4494_v30 }
 0x1d3   :  { %697 = vmatprep.mubr.bf16.mxu1 %v4498_v32 }
 0x1d4   :  { %3698 = vmatpush3.bf16.msra.mxu0 %v4115_v8 }
 0x1d6   :  { %3676 = vmatmul.mubr.bf16.gmra.mrb[56].mxu0 %v4977_v1 }
 0x1d7   :  { %3679 = vmatprep.mubr.bf16.mxu0 %v4978_v3 }
 0x1da   :  { %698 = vmatmul.mubr.bf16.gmra.mrb[76].mxu1 %v4979_v4 }
 0x1db   :  { %705 = vmatprep.mubr.bf16.mxu1 %v4980_v5 }
 0x1de   :  { %3680 = vmatmul.mubr.bf16.gmra.mrb[60].mxu0 %v4981_v7 }
 0x1e2   :  { %706 = vmatmul.mubr.bf16.gmra.mrb[80].mxu1 %v4982_v9 }
 0x1e3   :  { %713 = vmatprep.mubr.bf16.mxu1 %v4983_v12 }
 0x1ea   :  { %714 = vmatmul.mubr.bf16.gmra.mrb[84].mxu1 %v4984_v13 }
 0x1eb   :  { %721 = vmatprep.mubr.bf16.mxu1 %v4985_v15 }
 0x1f2   :  { %722 = vmatmul.mubr.bf16.gmra.mrb[88].mxu1 %v4986_v17 }
 0x1f3   :  { %729 = vmatprep.mubr.bf16.mxu1 %v4987_v19 }
 0x1fa   :  { %730 = vmatmul.mubr.bf16.gmra.mrb[92].mxu1 %v4988_v21 }
 0x1fb   :  { %1580 = vmatprep.mubr.bf16.mxu1 %v4989_v23 }
 0x255   :  { %v3123_v26 = vpop.f32.mrb[32].mxu1 }
 0x256   :  { %v3124_v30 = vpop.f32.mrb[33].mxu1 }
 0x257   :  { %v3125_v32 = vadd.f32 %v3124_v30, %v3123_v26  ;;  %v3126_v34 = vpop.f32.mrb[34].mxu1 }
 0x258   :  { %v3127_v35 = vpop.f32.mrb[35].mxu1 }
 0x259   :  { %v3128_v36 = vadd.f32 %v3127_v35, %v3126_v34 }
 0x25b   :  { %v738_v38 = vpack.c.bf16 %v3128_v36, %v3125_v32 }
 0x25d   :  { %v3129_v40 = vpop.f32.mrb[36].mxu1  ;;  %3699 = vmatprep.mubr.bf16.mxu0 %v738_v38 }
 0x25e   :  { %v3130_v42 = vpop.f32.mrb[37].mxu1 }
 0x25f   :  { %v3131_v44 = vadd.f32 %v3130_v42, %v3129_v40  ;;  %v3132_v46 = vpop.f32.mrb[38].mxu1 }
 0x260   :  { %v3133_v48 = vpop.f32.mrb[39].mxu1 }
 0x261   :  { %v3134_v50 = vadd.f32 %v3133_v48, %v3132_v46 }
 0x263   :  { %v739_v53 = vpack.c.bf16 %v3134_v50, %v3131_v44 }
 0x265   :  { %v3135_v60 = vpop.f32.mrb[40].mxu1  ;;  %3700 = vmatmul.mubr.bf16.vlgmr.msra.gmra.mrb[32].mxu0 %v739_v53 }
 0x266   :  { %v3136_v45 = vpop.f32.mrb[41].mxu1 }
 0x267   :  { %v3137_v43 = vadd.f32 %v3136_v45, %v3135_v60  ;;  %v3138_v41 = vpop.f32.mrb[42].mxu1 }
 0x268   :  { %v3139_v39 = vpop.f32.mrb[43].mxu1 }
 0x269   :  { %v3140_v27 = vadd.f32 %v3139_v39, %v3138_v41 }
 0x26b   :  { %v740_v28 = vpack.c.bf16 %v3140_v27, %v3137_v43 }
 0x26d   :  { %v3141_v33 = vpop.f32.mrb[44].mxu1  ;;  %3703 = vmatprep.mubr.bf16.mxu0 %v740_v28 }
 0x26e   :  { %v3142_v11 = vpop.f32.mrb[45].mxu1 }
 0x26f   :  { %v3143_v16 = vadd.f32 %v3142_v11, %v3141_v33  ;;  %v3144_v51 = vpop.f32.mrb[46].mxu1 }
 0x270   :  { %v3145_v52 = vpop.f32.mrb[47].mxu1 }
 0x271   :  { %v3146_v54 = vadd.f32 %v3145_v52, %v3144_v51 }
 0x273   :  { %v741_v55 = vpack.c.bf16 %v3146_v54, %v3143_v16 }
 0x275   :  { %v3147_v49 = vpop.f32.mrb[48].mxu1  ;;  %3704 = vmatmul.mubr.bf16.gmra.mrb[36].mxu0 %v741_v55 }
 0x276   :  { %v3148_v56 = vpop.f32.mrb[49].mxu1 }
 0x277   :  { %v3149_v57 = vadd.f32 %v3148_v56, %v3147_v49  ;;  %v3150_v47 = vpop.f32.mrb[50].mxu1 }
 0x278   :  { %v3151_v58 = vpop.f32.mrb[51].mxu1 }
 0x279   :  { %v3152_v59 = vadd.f32 %v3151_v58, %v3150_v47 }
 0x27b   :  { %v742_v62 = vpack.c.bf16 %v3152_v59, %v3149_v57 }
 0x27d   :  { %v3153_v63 = vpop.f32.mrb[52].mxu1  ;;  %3707 = vmatprep.mubr.bf16.mxu0 %v742_v62 }
 0x27e   :  { %v3154_v37 = vpop.f32.mrb[53].mxu1 }
 0x27f   :  { %v3155_v61 = vadd.f32 %v3154_v37, %v3153_v63  ;;  %v3156_v25 = vpop.f32.mrb[54].mxu1 }
 0x280   :  { %v3157_v14 = vpop.f32.mrb[55].mxu1 }
 0x281   :  { %v3158_v10 = vadd.f32 %v3157_v14, %v3156_v25 }
 0x283   :  { %v743_v18 = vpack.c.bf16 %v3158_v10, %v3155_v61 }
 0x285   :  { %v3159_v20 = vpop.f32.mrb[56].mxu1  ;;  %3708 = vmatmul.mubr.bf16.gmra.mrb[40].mxu0 %v743_v18 }
 0x286   :  { %v3160_v22 = vpop.f32.mrb[57].mxu1 }
 0x287   :  { %v3161_v24 = vadd.f32 %v3160_v22, %v3159_v20  ;;  %v3162_v29 = vpop.f32.mrb[58].mxu1 }
 0x288   :  { %v3163_v31 = vpop.f32.mrb[59].mxu1 }
 0x289   :  { %v3164_v0 = vadd.f32 %v3163_v31, %v3162_v29 }
 0x28b   :  { %v744_v1 = vpack.c.bf16 %v3164_v0, %v3161_v24 }
 0x28d   :  { %v3165_v2 = vpop.f32.mrb[60].mxu1  ;;  %3711 = vmatprep.mubr.bf16.mxu0 %v744_v1  ;;  %v4634_v1 = vld [vmem:[%s4940_s3] ss:$0 sm:$0xff] }
 0x28e   :  { %v3166_v3 = vpop.f32.mrb[61].mxu1 }
 0x28f   :  { %v3167_v4 = vadd.f32 %v3166_v3, %v3165_v2  ;;  %v3168_v5 = vpop.f32.mrb[62].mxu1 }
 0x290   :  { %v3169_v6 = vpop.f32.mrb[63].mxu1 }
 0x291   :  { %v3170_v7 = vadd.f32 %v3169_v6, %v3168_v5 }
 0x293   :  { %v745_v8 = vpack.c.bf16 %v3170_v7, %v3167_v4 }
 0x295   :  { %v3171_v9 = vpop.f32.mrb[64].mxu1  ;;  %3712 = vmatmul.mubr.bf16.gmra.mrb[44].mxu0 %v745_v8 }
 0x296   :  { %v3172_v12 = vpop.f32.mrb[65].mxu1 }
 0x297   :  { %v3173_v13 = vadd.f32 %v3172_v12, %v3171_v9  ;;  %v3174_v15 = vpop.f32.mrb[66].mxu1 }
 0x298   :  { %v3175_v17 = vpop.f32.mrb[67].mxu1 }
 0x299   :  { %v3176_v19 = vadd.f32 %v3175_v17, %v3174_v15 }
 0x29b   :  { %v746_v21 = vpack.c.bf16 %v3176_v19, %v3173_v13 }
 0x29d   :  { %v3177_v23 = vpop.f32.mrb[68].mxu1  ;;  %3715 = vmatprep.mubr.bf16.mxu0 %v746_v21 }
 0x29e   :  { %v3178_v26 = vpop.f32.mrb[69].mxu1 }
 0x29f   :  { %v3179_v30 = vadd.f32 %v3178_v26, %v3177_v23  ;;  %v3180_v32 = vpop.f32.mrb[70].mxu1 }
 0x2a0   :  { %v3181_v34 = vpop.f32.mrb[71].mxu1 }
 0x2a1   :  { %v3182_v35 = vadd.f32 %v3181_v34, %v3180_v32 }
 0x2a3   :  { %v747_v36 = vpack.c.bf16 %v3182_v35, %v3179_v30 }
 0x2a5   :  { %3716 = vmatmul.mubr.bf16.gmra.mrb[48].mxu0 %v747_v36  ;;  %v3183_v38 = vpop.f32.mrb[72].mxu1 }
 0x2a6   :  { %v3184_v40 = vpop.f32.mrb[73].mxu1 }
 0x2a7   :  { %v3185_v42 = vadd.f32 %v3184_v40, %v3183_v38  ;;  %v3186_v44 = vpop.f32.mrb[74].mxu1 }
 0x2a8   :  { %v3187_v46 = vpop.f32.mrb[75].mxu1 }
 0x2a9   :  { %v3188_v48 = vadd.f32 %v3187_v46, %v3186_v44 }
 0x2ab   :  { %v748_v50 = vpack.c.bf16 %v3188_v48, %v3185_v42 }
 0x2ad   :  { %v3189_v53 = vpop.f32.mrb[76].mxu1  ;;  %3719 = vmatprep.mubr.bf16.mxu0 %v748_v50 }
 0x2ae   :  { %v3190_v60 = vpop.f32.mrb[77].mxu1 }
 0x2af   :  { %v3191_v45 = vadd.f32 %v3190_v60, %v3189_v53  ;;  %v3192_v43 = vpop.f32.mrb[78].mxu1 }
 0x2b0   :  { %v3193_v41 = vpop.f32.mrb[79].mxu1 }
 0x2b1   :  { %v3194_v39 = vadd.f32 %v3193_v41, %v3192_v43 }
 0x2b3   :  { %v749_v27 = vpack.c.bf16 %v3194_v39, %v3191_v45 }
 0x2b5   :  { %3720 = vmatmul.mubr.bf16.gmra.mrb[52].mxu0 %v749_v27  ;;  %v3195_v28 = vpop.f32.mrb[80].mxu1 }
 0x2b6   :  { %v3196_v33 = vpop.f32.mrb[81].mxu1 }
 0x2b7   :  { %v3197_v11 = vadd.f32 %v3196_v33, %v3195_v28  ;;  %v3198_v16 = vpop.f32.mrb[82].mxu1 }
 0x2b8   :  { %v3199_v51 = vpop.f32.mrb[83].mxu1 }
 0x2b9   :  { %v3200_v52 = vadd.f32 %v3199_v51, %v3198_v16 }
 0x2bb   :  { %v750_v54 = vpack.c.bf16 %v3200_v52, %v3197_v11 }
 0x2bd   :  { %v3201_v55 = vpop.f32.mrb[84].mxu1  ;;  %3723 = vmatprep.mubr.bf16.mxu0 %v750_v54 }
 0x2be   :  { %v3202_v49 = vpop.f32.mrb[85].mxu1 }
 0x2bf   :  { %v3203_v56 = vadd.f32 %v3202_v49, %v3201_v55  ;;  %v3204_v57 = vpop.f32.mrb[86].mxu1 }
 0x2c0   :  { %v3205_v47 = vpop.f32.mrb[87].mxu1 }
 0x2c1   :  { %v3206_v58 = vadd.f32 %v3205_v47, %v3204_v57 }
 0x2c3   :  { %v751_v59 = vpack.c.bf16 %v3206_v58, %v3203_v56 }
 0x2c5   :  { %3724 = vmatmul.mubr.bf16.gmra.mrb[56].mxu0 %v751_v59  ;;  %v3207_v62 = vpop.f32.mrb[88].mxu1 }
 0x2c6   :  { %v3208_v63 = vpop.f32.mrb[89].mxu1 }
 0x2c7   :  { %v3209_v37 = vadd.f32 %v3208_v63, %v3207_v62  ;;  %v3210_v61 = vpop.f32.mrb[90].mxu1 }
 0x2c8   :  { %v3211_v25 = vpop.f32.mrb[91].mxu1 }
 0x2c9   :  { %v3212_v14 = vadd.f32 %v3211_v25, %v3210_v61 }
 0x2cb   :  { %v752_v10 = vpack.c.bf16 %v3212_v14, %v3209_v37 }
 0x2cd   :  { %v3213_v18 = vpop.f32.mrb[92].mxu1  ;;  %3727 = vmatprep.mubr.bf16.mxu0 %v752_v10 }
 0x2ce   :  { %v3214_v20 = vpop.f32.mrb[93].mxu1 }
 0x2cf   :  { %v3215_v22 = vadd.f32 %v3214_v20, %v3213_v18  ;;  %v3216_v24 = vpop.f32.mrb[94].mxu1 }
 0x2d0   :  { %v3217_v29 = vpop.f32.mrb[95].mxu1 }
 0x2d1   :  { %v3218_v31 = vadd.f32 %v3217_v29, %v3216_v24 }
 0x2d3   :  { %v753_v0 = vpack.c.bf16 %v3218_v31, %v3215_v22 }
 0x2d5   :  { %3728 = vmatmul.mubr.bf16.gmra.mrb[60].mxu0 %v753_v0 }
 0x338   :  { %v3701_v2 = vpop.f32.mrb[32].mxu0 }
 0x339   :  { %v1470_v3 = vadd.f32 %v3701_v2, %v4634_v1  ;;  %v1302_v4 = vpop.f32.mrb[33].mxu0 }
 0x33a   :  { %v1468_v5 = vadd.f32 %v4634_v1, %v1302_v4  ;;  %v3702_v6 = vpop.f32.mrb[34].mxu0 }
 0x33b   :  { %v1471_v7 = vadd.f32 %v3702_v6, %v4634_v1  ;;  %v1305_v8 = vpop.f32.mrb[35].mxu0  ;;  %v1502_v12 = vmax.f32 %v1470_v3, 0.0 }
 0x33c   :  { %v1469_v9 = vadd.f32 %v4634_v1, %v1305_v8  ;;  %v1500_v15 = vmax.f32 %v1468_v5, 0.0 }
 0x33d   :  { %v1503_v13 = vmax.f32 %v1471_v7, 0.0 }
 0x33e   :  { %v1501_v17 = vmax.f32 %v1469_v9, 0.0 }
 0x33f   :  { %v4640_v19 = vpack.c.bf16 %v1503_v13, %v1502_v12 }
 0x340   :  { %v4642_v21 = vpack.c.bf16 %v1501_v17, %v1500_v15 }
 0x348   :  { %v3705_v23 = vpop.f32.mrb[36].mxu0 }
 0x349   :  { %v1474_v26 = vadd.f32 %v3705_v23, %v4634_v1  ;;  %v1318_v30 = vpop.f32.mrb[37].mxu0 }
 0x34a   :  { %v1472_v32 = vadd.f32 %v4634_v1, %v1318_v30  ;;  %v3706_v34 = vpop.f32.mrb[38].mxu0 }
 0x34b   :  { %v1475_v35 = vadd.f32 %v3706_v34, %v4634_v1  ;;  %v1321_v36 = vpop.f32.mrb[39].mxu0  ;;  %v1506_v40 = vmax.f32 %v1474_v26, 0.0 }
 0x34c   :  { %v1473_v38 = vadd.f32 %v4634_v1, %v1321_v36  ;;  %v1504_v44 = vmax.f32 %v1472_v32, 0.0 }
 0x34d   :  { %v1507_v42 = vmax.f32 %v1475_v35, 0.0 }
 0x34e   :  { %v1505_v46 = vmax.f32 %v1473_v38, 0.0 }
 0x34f   :  { %v4648_v48 = vpack.c.bf16 %v1507_v42, %v1506_v40 }
 0x350   :  { %v4650_v50 = vpack.c.bf16 %v1505_v46, %v1504_v44 }
 0x358   :  { %v3709_v53 = vpop.f32.mrb[40].mxu0 }
 0x359   :  { %v1478_v60 = vadd.f32 %v3709_v53, %v4634_v1  ;;  %v1334_v45 = vpop.f32.mrb[41].mxu0 }
 0x35a   :  { %v1476_v43 = vadd.f32 %v4634_v1, %v1334_v45  ;;  %v3710_v41 = vpop.f32.mrb[42].mxu0 }
 0x35b   :  { %v1479_v39 = vadd.f32 %v3710_v41, %v4634_v1  ;;  %v1337_v27 = vpop.f32.mrb[43].mxu0  ;;  %v1510_v33 = vmax.f32 %v1478_v60, 0.0 }
 0x35c   :  { %v1477_v28 = vadd.f32 %v4634_v1, %v1337_v27  ;;  %v1508_v16 = vmax.f32 %v1476_v43, 0.0 }
 0x35d   :  { %v1511_v11 = vmax.f32 %v1479_v39, 0.0 }
 0x35e   :  { %v1509_v51 = vmax.f32 %v1477_v28, 0.0 }
 0x35f   :  { %v4656_v52 = vpack.c.bf16 %v1511_v11, %v1510_v33 }
 0x360   :  { %v4658_v54 = vpack.c.bf16 %v1509_v51, %v1508_v16 }
 0x368   :  { %v3713_v55 = vpop.f32.mrb[44].mxu0 }
 0x369   :  { %v1482_v49 = vadd.f32 %v3713_v55, %v4634_v1  ;;  %v1350_v56 = vpop.f32.mrb[45].mxu0 }
 0x36a   :  { %v1480_v57 = vadd.f32 %v4634_v1, %v1350_v56  ;;  %v3714_v47 = vpop.f32.mrb[46].mxu0 }
 0x36b   :  { %v1483_v58 = vadd.f32 %v3714_v47, %v4634_v1  ;;  %v1353_v59 = vpop.f32.mrb[47].mxu0  ;;  %v1514_v63 = vmax.f32 %v1482_v49, 0.0 }
 0x36c   :  { %v1481_v62 = vadd.f32 %v4634_v1, %v1353_v59  ;;  %v1512_v61 = vmax.f32 %v1480_v57, 0.0 }
 0x36d   :  { %v1515_v37 = vmax.f32 %v1483_v58, 0.0 }
 0x36e   :  { %v1513_v25 = vmax.f32 %v1481_v62, 0.0 }
 0x36f   :  { %v4664_v14 = vpack.c.bf16 %v1515_v37, %v1514_v63 }
 0x370   :  { %v4666_v10 = vpack.c.bf16 %v1513_v25, %v1512_v61 }
 0x378   :  { %v3717_v18 = vpop.f32.mrb[48].mxu0 }
 0x379   :  { %v1486_v20 = vadd.f32 %v3717_v18, %v4634_v1  ;;  %v1366_v22 = vpop.f32.mrb[49].mxu0 }
 0x37a   :  { %v1484_v24 = vadd.f32 %v4634_v1, %v1366_v22  ;;  %v3718_v29 = vpop.f32.mrb[50].mxu0  ;;  %v4117_v22 = vld [vmem:[#allocation8 + $0x48] sm:$0xff]  }
 0x37b   :  { %v1487_v31 = vadd.f32 %v3718_v29, %v4634_v1  ;;  %v1369_v0 = vpop.f32.mrb[51].mxu0  ;;  %v1518_v3 = vmax.f32 %v1486_v20, 0.0  ;;  %v4116_v20 = vld [vmem:[#allocation8 + $0x40] sm:$0xff]   ;;  %v4119_v29 = vld [vmem:[#allocation8 + $0x58] sm:$0xff]  }
 0x37c   :  { %v1485_v2 = vadd.f32 %v4634_v1, %v1369_v0  ;;  %v1516_v5 = vmax.f32 %v1484_v24, 0.0  ;;  %3731 = vmatprep.subr.bf16.mxu0 %v4116_v20  ;;  %v4716_v24 = vld [vmem:[#allocation2] ss:$8 sps:$4 sm:$0xff]   ;;  %v4722_v0 = vld [vmem:[#allocation2 + $0x10] ss:$8 sps:$4 sm:$0xff]  }
 0x37d   :  { %v1519_v4 = vmax.f32 %v1487_v31, 0.0  ;;  %3732 = vmatpush3.bf16.msra.mxu0 %v4116_v20  ;;  %v4719_v31 = vld [vmem:[#allocation2 + $0x14] ss:$8 sps:$4 sm:$0xff]  }
 0x37e   :  { %v1517_v6 = vmax.f32 %v1485_v2, 0.0  ;;  %3733 = vmatprep.subr.bf16.mxu0 %v4117_v22  ;;  %v4725_v2 = vld [vmem:[#allocation2 + $0x24] ss:$8 sps:$4 sm:$0xff]  }
 0x37f   :  { %v4672_v7 = vpack.c.bf16 %v1519_v4, %v1518_v3  ;;  %v4728_v3 = vld [vmem:[#allocation2 + $0x20] ss:$8 sps:$4 sm:$0xff]   ;;  %v4731_v4 = vld [vmem:[#allocation2 + $0x34] ss:$8 sps:$4 sm:$0xff]  }
 0x380   :  { %v4674_v8 = vpack.c.bf16 %v1517_v6, %v1516_v5  ;;  %v4734_v5 = vld [vmem:[#allocation2 + $0x30] ss:$8 sps:$4 sm:$0xff]   ;;  %v4737_v6 = vld [vmem:[#allocation2 + $0x44] ss:$8 sps:$4 sm:$0xff]  }
 0x381   :  { %3734 = vmatpush3.bf16.msra.mxu0 %v4117_v22 }
 0x382   :  { %3291 = vmatprep.subr.bf16.mxu1 %v4674_v8 }
 0x383   :  { %3292 = vmatpush3.bf16.msra.mxu1 %v4642_v21 }
 0x384   :  { %3293 = vmatprep.subr.bf16.mxu1 %v4672_v7 }
 0x387   :  { %3294 = vmatpush3.bf16.msra.mxu1 %v4640_v19 }
 0x388   :  { %v3721_v9 = vpop.f32.mrb[52].mxu0 }
 0x389   :  { %v1490_v12 = vadd.f32 %v3721_v9, %v4634_v1  ;;  %v1382_v13 = vpop.f32.mrb[53].mxu0  ;;  %v4740_v9 = vld [vmem:[#allocation2 + $0x40] ss:$8 sps:$4 sm:$0xff]  }
 0x38a   :  { %v1488_v15 = vadd.f32 %v4634_v1, %v1382_v13  ;;  %v3722_v17 = vpop.f32.mrb[54].mxu0  ;;  %v4746_v13 = vld [vmem:[#allocation2 + $0x50] ss:$8 sps:$4 sm:$0xff]  }
 0x38b   :  { %v1491_v23 = vadd.f32 %v3722_v17, %v4634_v1  ;;  %v1385_v26 = vpop.f32.mrb[55].mxu0  ;;  %v1522_v32 = vmax.f32 %v1490_v12, 0.0  ;;  %v4743_v12 = vld [vmem:[#allocation2 + $0x54] ss:$8 sps:$4 sm:$0xff]   ;;  %v4752_v17 = vld [vmem:[#allocation2 + $0x60] ss:$8 sps:$4 sm:$0xff]  }
 0x38c   :  { %v1489_v30 = vadd.f32 %v4634_v1, %v1385_v26  ;;  %v1520_v35 = vmax.f32 %v1488_v15, 0.0  ;;  %v4749_v15 = vld [vmem:[#allocation2 + $0x64] ss:$8 sps:$4 sm:$0xff]   ;;  %v4758_v26 = vld [vmem:[#allocation2 + $0x70] ss:$8 sps:$4 sm:$0xff]  }
 0x38d   :  { %v1523_v34 = vmax.f32 %v1491_v23, 0.0  ;;  %v4755_v23 = vld [vmem:[#allocation2 + $0x74] ss:$8 sps:$4 sm:$0xff]  }
 0x38e   :  { %v1521_v36 = vmax.f32 %v1489_v30, 0.0  ;;  %v4761_v30 = vld [vmem:[#allocation2 + $0x84] ss:$8 sps:$4 sm:$0xff]  }
 0x38f   :  { %v4684_v38 = vpack.c.bf16 %v1523_v34, %v1522_v32  ;;  %v4764_v32 = vld [vmem:[#allocation2 + $0x80] ss:$8 sps:$4 sm:$0xff]   ;;  %v4767_v34 = vld [vmem:[#allocation2 + $0x94] ss:$8 sps:$4 sm:$0xff]  }
 0x390   :  { %v4686_v40 = vpack.c.bf16 %v1521_v36, %v1520_v35  ;;  %v4770_v35 = vld [vmem:[#allocation2 + $0x90] ss:$8 sps:$4 sm:$0xff]   ;;  %v4773_v36 = vld [vmem:[#allocation2 + $0xa4] ss:$8 sps:$4 sm:$0xff]  }
 0x392   :  { %3295 = vmatprep.subr.bf16.mxu1 %v4686_v40 }
 0x393   :  { %3296 = vmatpush3.bf16.msra.mxu1 %v4650_v50 }
 0x394   :  { %3297 = vmatprep.subr.bf16.mxu1 %v4684_v38 }
 0x397   :  { %3298 = vmatpush3.bf16.msra.mxu1 %v4648_v48 }
 0x398   :  { %v3725_v42 = vpop.f32.mrb[56].mxu0 }
 0x399   :  { %v1494_v44 = vadd.f32 %v3725_v42, %v4634_v1  ;;  %v1398_v46 = vpop.f32.mrb[57].mxu0  ;;  %v4776_v42 = vld [vmem:[#allocation2 + $0xa0] ss:$8 sps:$4 sm:$0xff]  }
 0x39a   :  { %v1492_v53 = vadd.f32 %v4634_v1, %v1398_v46  ;;  %v3726_v60 = vpop.f32.mrb[58].mxu0  ;;  %v4120_v46 = vld [vmem:[#allocation8 + $0x60] sm:$0xff]  }
 0x39b   :  { %v1495_v45 = vadd.f32 %v3726_v60, %v4634_v1  ;;  %v1401_v43 = vpop.f32.mrb[59].mxu0  ;;  %v1526_v39 = vmax.f32 %v1494_v44, 0.0  ;;  %v4779_v44 = vld [vmem:[#allocation2 + $0xb4] ss:$8 sps:$4 sm:$0xff]   ;;  %v4782_v60 = vld [vmem:[#allocation2 + $0xb0] ss:$8 sps:$4 sm:$0xff]  }
 0x39c   :  { %v1493_v41 = vadd.f32 %v4634_v1, %v1401_v43  ;;  %v1524_v28 = vmax.f32 %v1492_v53, 0.0  ;;  %v4121_v53 = vld [vmem:[#allocation8 + $0x68] sm:$0xff]   ;;  %v4122_v43 = vld [vmem:[#allocation8 + $0x70] sm:$0xff]  }
 0x39d   :  { %v1527_v27 = vmax.f32 %v1495_v45, 0.0  ;;  %v4785_v45 = vld [vmem:[#allocation2 + $0xc4] ss:$8 sps:$4 sm:$0xff]  }
 0x39e   :  { %v1525_v33 = vmax.f32 %v1493_v41, 0.0  ;;  %v4123_v41 = vld [vmem:[#allocation8 + $0x78] sm:$0xff]  }
 0x39f   :  { %v4696_v11 = vpack.c.bf16 %v1527_v27, %v1526_v39  ;;  %v4788_v39 = vld [vmem:[#allocation2 + $0xc0] ss:$8 sps:$4 sm:$0xff]   ;;  %v4791_v27 = vld [vmem:[#allocation2 + $0xd4] ss:$8 sps:$4 sm:$0xff]  }
 0x3a0   :  { %v4698_v16 = vpack.c.bf16 %v1525_v33, %v1524_v28  ;;  %4990 = vst [vmem:[#allocation15_spill] sm:$0xff] %v4788_v39  ;;  %4991 = vst [vmem:[#allocation17_spill] sm:$0xff] %v4791_v27  ;;  %v4794_v28 = vld [vmem:[#allocation2 + $0xd0] ss:$8 sps:$4 sm:$0xff]   ;;  %v4797_v33 = vld [vmem:[#allocation2 + $0xe4] ss:$8 sps:$4 sm:$0xff]  }
 0x3a1   :  { %4992 = vst [vmem:[#allocation19_spill] sm:$0xff] %v4794_v28  ;;  %4993 = vst [vmem:[#allocation20_spill] sm:$0xff] %v4797_v33 }
 0x3a2   :  { %3299 = vmatprep.subr.bf16.mxu1 %v4698_v16 }
 0x3a3   :  { %3300 = vmatpush3.bf16.msra.mxu1 %v4658_v54 }
 0x3a4   :  { %3301 = vmatprep.subr.bf16.mxu1 %v4696_v11 }
 0x3a7   :  { %3302 = vmatpush3.bf16.msra.mxu1 %v4656_v52 }
 0x3a8   :  { %v3729_v51 = vpop.f32.mrb[60].mxu0 }
 0x3a9   :  { %v1498_v55 = vadd.f32 %v3729_v51, %v4634_v1  ;;  %v1414_v49 = vpop.f32.mrb[61].mxu0  ;;  %v4800_v51 = vld [vmem:[#allocation2 + $0xe0] ss:$8 sps:$4 sm:$0xff]  }
 0x3aa   :  { %v1496_v56 = vadd.f32 %v4634_v1, %v1414_v49  ;;  %v3730_v57 = vpop.f32.mrb[62].mxu0  ;;  %4994 = vst [vmem:[#allocation18_spill] sm:$0xff] %v4800_v51  ;;  %v4806_v49 = vld [vmem:[#allocation2 + $0xf0] ss:$8 sps:$4 sm:$0xff]  }
 0x3ab   :  { %v1499_v47 = vadd.f32 %v3730_v57, %v4634_v1  ;;  %v1417_v58 = vpop.f32.mrb[63].mxu0  ;;  %v1530_v62 = vmax.f32 %v1498_v55, 0.0  ;;  %v4803_v55 = vld [vmem:[#allocation2 + $0xf4] ss:$8 sps:$4 sm:$0xff]   ;;  %4996 = vst [vmem:[#allocation22_spill] sm:$0xff] %v4806_v49  ;;  %v4124_v57 = vld [vmem:[#allocation8] sm:$0xff]  }
 0x3ac   :  { %v1497_v59 = vadd.f32 %v4634_v1, %v1417_v58  ;;  %v1528_v37 = vmax.f32 %v1496_v56, 0.0  ;;  %v4118_v1 = vld [vmem:[#allocation8 + $0x50] sm:$0xff]   ;;  %4995 = vst [vmem:[#allocation21_spill] sm:$0xff] %v4803_v55  ;;  %v4171_v56 = vld [vmem:[#allocation2 + $0x4] ss:$8 sps:$4 sm:$0xff]  }
 0x3ad   :  { %v1531_v63 = vmax.f32 %v1499_v47, 0.0  ;;  %3735 = vmatprep.subr.bf16.mxu0 %v4118_v1 }
 0x3ae   :  { %v1529_v61 = vmax.f32 %v1497_v59, 0.0  ;;  %3736 = vmatpush3.bf16.msra.mxu0 %v4118_v1 }
 0x3af   :  { %v4708_v25 = vpack.c.bf16 %v1531_v63, %v1530_v62  ;;  %3737 = vmatprep.subr.bf16.mxu0 %v4119_v29 }
 0x3b0   :  { %v4710_v18 = vpack.c.bf16 %v1529_v61, %v1528_v37 }
 0x3b2   :  { %3303 = vmatprep.subr.bf16.mxu1 %v4710_v18  ;;  %3738 = vmatpush3.bf16.msra.mxu0 %v4119_v29 }
 0x3b3   :  { %3304 = vmatpush3.bf16.msra.mxu1 %v4666_v10  ;;  %3739 = vmatprep.subr.bf16.mxu0 %v4120_v46 }
 0x3b4   :  { %3305 = vmatprep.subr.bf16.mxu1 %v4708_v25 }
 0x3b6   :  { %3740 = vmatpush3.bf16.msra.mxu0 %v4120_v46 }
 0x3b7   :  { %3306 = vmatpush3.bf16.msra.mxu1 %v4664_v14  ;;  %3741 = vmatprep.subr.bf16.mxu0 %v4121_v53 }
 0x3ba   :  { %1581 = vmatmul.mubr.bf16.vlgmr.msra.gmra.mrb[96].mxu1 %v4716_v24  ;;  %3742 = vmatpush3.bf16.msra.mxu0 %v4121_v53 }
 0x3bb   :  { %1588 = vmatprep.mubr.bf16.mxu1 %v4719_v31  ;;  %3743 = vmatprep.subr.bf16.mxu0 %v4122_v43 }
 0x3be   :  { %3744 = vmatpush3.bf16.msra.mxu0 %v4122_v43 }
 0x3bf   :  { %3745 = vmatprep.subr.bf16.mxu0 %v4123_v41 }
 0x3c2   :  { %1589 = vmatmul.mubr.bf16.gmra.mrb[100].mxu1 %v4722_v0  ;;  %3746 = vmatpush3.bf16.msra.mxu0 %v4123_v41  ;;  %v4125_v41 = vld [vmem:[#allocation8 + $0x8] sm:$0xff]  }
 0x3c3   :  { %1596 = vmatprep.mubr.bf16.mxu1 %v4725_v2  ;;  %3779 = vmatprep.subr.bf16.mxu0 %v4124_v57 }
 0x3ca   :  { %1597 = vmatmul.mubr.bf16.gmra.mrb[104].mxu1 %v4728_v3 }
 0x3cb   :  { %1604 = vmatprep.mubr.bf16.mxu1 %v4731_v4 }
 0x3d2   :  { %1605 = vmatmul.mubr.bf16.gmra.mrb[108].mxu1 %v4734_v5 }
 0x3d3   :  { %1612 = vmatprep.mubr.bf16.mxu1 %v4737_v6 }
 0x3da   :  { %1613 = vmatmul.mubr.bf16.gmra.mrb[112].mxu1 %v4740_v9 }
 0x3db   :  { %1620 = vmatprep.mubr.bf16.mxu1 %v4743_v12 }
 0x3e2   :  { %1621 = vmatmul.mubr.bf16.gmra.mrb[116].mxu1 %v4746_v13 }
 0x3e3   :  { %1628 = vmatprep.mubr.bf16.mxu1 %v4749_v15 }
 0x3ea   :  { %1629 = vmatmul.mubr.bf16.gmra.mrb[120].mxu1 %v4752_v17 }
 0x3eb   :  { %1636 = vmatprep.mubr.bf16.mxu1 %v4755_v23 }
 0x3f2   :  { %1637 = vmatmul.mubr.bf16.gmra.mrb[124].mxu1 %v4758_v26 }
 0x3f3   :  { %1644 = vmatprep.mubr.bf16.mxu1 %v4761_v30 }
 0x3fa   :  { %1645 = vmatmul.mubr.bf16.gmra.mrb[128].mxu1 %v4764_v32 }
 0x3fb   :  { %1652 = vmatprep.mubr.bf16.mxu1 %v4767_v34 }
 0x402   :  { %1653 = vmatmul.mubr.bf16.gmra.mrb[132].mxu1 %v4770_v35 }
 0x403   :  { %1660 = vmatprep.mubr.bf16.mxu1 %v4773_v36 }
 0x40a   :  { %1661 = vmatmul.mubr.bf16.gmra.mrb[136].mxu1 %v4776_v42 }
 0x40b   :  { %1668 = vmatprep.mubr.bf16.mxu1 %v4779_v44 }
 0x412   :  { %1669 = vmatmul.mubr.bf16.gmra.mrb[140].mxu1 %v4782_v60 }
 0x413   :  { %1676 = vmatprep.mubr.bf16.mxu1 %v4785_v45 }
 0x41a   :  { %1677 = vmatmul.mubr.bf16.gmra.mrb[144].mxu1 %v4788_v39 }
 0x41b   :  { %1684 = vmatprep.mubr.bf16.mxu1 %v4791_v27 }
 0x422   :  { %1685 = vmatmul.mubr.bf16.gmra.mrb[148].mxu1 %v4794_v28 }
 0x423   :  { %1692 = vmatprep.mubr.bf16.mxu1 %v4797_v33 }
 0x42a   :  { %1693 = vmatmul.mubr.bf16.gmra.mrb[152].mxu1 %v4800_v51 }
 0x42b   :  { %1700 = vmatprep.mubr.bf16.mxu1 %v4803_v55 }
 0x432   :  { %1701 = vmatmul.mubr.bf16.gmra.mrb[156].mxu1 %v4806_v49 }
 0x433   :  { %1757 = vmatprep.mubr.bf16.mxu1 %v4171_v56 }
 0x48d   :  { %v3307_v47 = vpop.f32.mrb[96].mxu1 }
 0x48e   :  { %v3308_v58 = vpop.f32.mrb[97].mxu1 }
 0x48f   :  { %v3309_v59 = vadd.f32 %v3308_v58, %v3307_v47  ;;  %v3310_v62 = vpop.f32.mrb[98].mxu1 }
 0x490   :  { %v3311_v63 = vpop.f32.mrb[99].mxu1 }
 0x491   :  { %v3312_v37 = vadd.f32 %v3311_v63, %v3310_v62 }
 0x493   :  { %v4809_v61 = vpack.c.bf16 %v3312_v37, %v3309_v59  ;;  %v4126_v59 = vld [vmem:[#allocation8 + $0x10] sm:$0xff]  }
 0x495   :  { %v3313_v20 = vpop.f32.mrb[100].mxu1  ;;  %3747 = vmatprep.mubr.bf16.mxu0 %v4809_v61 }
 0x496   :  { %v3314_v22 = vpop.f32.mrb[101].mxu1 }
 0x497   :  { %v3315_v1 = vadd.f32 %v3314_v22, %v3313_v20  ;;  %v3316_v29 = vpop.f32.mrb[102].mxu1  ;;  %v4127_v20 = vld [vmem:[#allocation8 + $0x18] sm:$0xff]  }
 0x498   :  { %v3317_v46 = vpop.f32.mrb[103].mxu1 }
 0x499   :  { %v3318_v53 = vadd.f32 %v3317_v46, %v3316_v29 }
 0x49b   :  { %v4812_v43 = vpack.c.bf16 %v3318_v53, %v3315_v1 }
 0x49d   :  { %v3319_v56 = vpop.f32.mrb[104].mxu1  ;;  %3748 = vmatmul.mubr.bf16.vlgmr.msra.gmra.mrb[64].mxu0 %v4812_v43 }
 0x49e   :  { %v3320_v47 = vpop.f32.mrb[105].mxu1  ;;  %3780 = vmatpush3.bf16.msra.mxu0 %v4124_v57  ;;  %v4128_v57 = vld [vmem:[#allocation8 + $0x20] sm:$0xff]  }
 0x49f   :  { %v3321_v58 = vadd.f32 %v3320_v47, %v3319_v56  ;;  %v3322_v62 = vpop.f32.mrb[106].mxu1  ;;  %3781 = vmatprep.subr.bf16.mxu0 %v4125_v41 }
 0x4a0   :  { %v3323_v63 = vpop.f32.mrb[107].mxu1 }
 0x4a1   :  { %v3324_v37 = vadd.f32 %v3323_v63, %v3322_v62 }
 0x4a2   :  { %3782 = vmatpush3.bf16.msra.mxu0 %v4125_v41  ;;  %v4129_v41 = vld [vmem:[#allocation8 + $0x28] sm:$0xff]  }
 0x4a3   :  { %v4815_v49 = vpack.c.bf16 %v3324_v37, %v3321_v58  ;;  %3783 = vmatprep.subr.bf16.mxu0 %v4126_v59 }
 0x4a5   :  { %v3325_v22 = vpop.f32.mrb[108].mxu1  ;;  %3751 = vmatprep.mubr.bf16.mxu0 %v4815_v49 }
 0x4a6   :  { %v3326_v1 = vpop.f32.mrb[109].mxu1  ;;  %3784 = vmatpush3.bf16.msra.mxu0 %v4126_v59  ;;  %v4130_v59 = vld [vmem:[#allocation8 + $0x30] sm:$0xff]  }
 0x4a7   :  { %v3327_v29 = vadd.f32 %v3326_v1, %v3325_v22  ;;  %v3328_v46 = vpop.f32.mrb[110].mxu1  ;;  %3785 = vmatprep.subr.bf16.mxu0 %v4127_v20 }
 0x4a8   :  { %v3329_v53 = vpop.f32.mrb[111].mxu1 }
 0x4a9   :  { %v3330_v56 = vadd.f32 %v3329_v53, %v3328_v46 }
 0x4aa   :  { %3786 = vmatpush3.bf16.msra.mxu0 %v4127_v20  ;;  %v4131_v20 = vld [vmem:[#allocation8 + $0x38] sm:$0xff]  }
 0x4ab   :  { %v4818_v47 = vpack.c.bf16 %v3330_v56, %v3327_v29  ;;  %3787 = vmatprep.subr.bf16.mxu0 %v4128_v57 }
 0x4ad   :  { %v3331_v58 = vpop.f32.mrb[112].mxu1  ;;  %3752 = vmatmul.mubr.bf16.gmra.mrb[68].mxu0 %v4818_v47 }
 0x4ae   :  { %v3332_v62 = vpop.f32.mrb[113].mxu1  ;;  %3788 = vmatpush3.bf16.msra.mxu0 %v4128_v57 }
 0x4af   :  { %v3333_v63 = vadd.f32 %v3332_v62, %v3331_v58  ;;  %v3334_v37 = vpop.f32.mrb[114].mxu1  ;;  %3789 = vmatprep.subr.bf16.mxu0 %v4129_v41 }
 0x4b0   :  { %v3335_v22 = vpop.f32.mrb[115].mxu1 }
 0x4b1   :  { %v3336_v1 = vadd.f32 %v3335_v22, %v3334_v37 }
 0x4b2   :  { %3790 = vmatpush3.bf16.msra.mxu0 %v4129_v41 }
 0x4b3   :  { %v4821_v55 = vpack.c.bf16 %v3336_v1, %v3333_v63  ;;  %3791 = vmatprep.subr.bf16.mxu0 %v4130_v59 }
 0x4b5   :  { %v3337_v29 = vpop.f32.mrb[116].mxu1  ;;  %3755 = vmatprep.mubr.bf16.mxu0 %v4821_v55 }
 0x4b6   :  { %v3338_v46 = vpop.f32.mrb[117].mxu1  ;;  %3792 = vmatpush3.bf16.msra.mxu0 %v4130_v59 }
 0x4b7   :  { %v3339_v53 = vadd.f32 %v3338_v46, %v3337_v29  ;;  %v3340_v56 = vpop.f32.mrb[118].mxu1  ;;  %3793 = vmatprep.subr.bf16.mxu0 %v4131_v20 }
 0x4b8   :  { %v3341_v57 = vpop.f32.mrb[119].mxu1 }
 0x4b9   :  { %v3342_v58 = vadd.f32 %v3341_v57, %v3340_v56 }
 0x4ba   :  { %3794 = vmatpush3.bf16.msra.mxu0 %v4131_v20 }
 0x4bb   :  { %v4824_v62 = vpack.c.bf16 %v3342_v58, %v3339_v53 }
 0x4bd   :  { %v3343_v51 = vpop.f32.mrb[120].mxu1  ;;  %3756 = vmatmul.mubr.bf16.gmra.mrb[72].mxu0 %v4824_v62 }
 0x4be   :  { %v3344_v41 = vpop.f32.mrb[121].mxu1 }
 0x4bf   :  { %v3345_v63 = vadd.f32 %v3344_v41, %v3343_v51  ;;  %v3346_v37 = vpop.f32.mrb[122].mxu1 }
 0x4c0   :  { %v3347_v22 = vpop.f32.mrb[123].mxu1 }
 0x4c1   :  { %v3348_v1 = vadd.f32 %v3347_v22, %v3346_v37 }
 0x4c3   :  { %v4827_v33 = vpack.c.bf16 %v3348_v1, %v3345_v63 }
 0x4c5   :  { %v3349_v28 = vpop.f32.mrb[124].mxu1  ;;  %3759 = vmatprep.mubr.bf16.mxu0 %v4827_v33 }
 0x4c6   :  { %v3350_v59 = vpop.f32.mrb[125].mxu1 }
 0x4c7   :  { %v3351_v29 = vadd.f32 %v3350_v59, %v3349_v28  ;;  %v3352_v46 = vpop.f32.mrb[126].mxu1 }
 0x4c8   :  { %v3353_v56 = vpop.f32.mrb[127].mxu1 }
 0x4c9   :  { %v3354_v20 = vadd.f32 %v3353_v56, %v3352_v46 }
 0x4cb   :  { %v4830_v53 = vpack.c.bf16 %v3354_v20, %v3351_v29 }
 0x4cd   :  { %v3355_v57 = vpop.f32.mrb[128].mxu1  ;;  %3760 = vmatmul.mubr.bf16.gmra.mrb[76].mxu0 %v4830_v53 }
 0x4ce   :  { %v3356_v58 = vpop.f32.mrb[129].mxu1 }
 0x4cf   :  { %v3357_v51 = vadd.f32 %v3356_v58, %v3355_v57  ;;  %v3358_v41 = vpop.f32.mrb[130].mxu1 }
 0x4d0   :  { %v3359_v27 = vpop.f32.mrb[131].mxu1 }
 0x4d1   :  { %v3360_v37 = vadd.f32 %v3359_v27, %v3358_v41 }
 0x4d3   :  { %v1717_v63 = vpack.c.bf16 %v3360_v37, %v3357_v51 }
 0x4d5   :  { %v3361_v22 = vpop.f32.mrb[132].mxu1  ;;  %3403 = vmatprep.subr.bf16.mxu1 %v1717_v63  ;;  %3763 = vmatprep.mubr.bf16.mxu0 %v1717_v63 }
 0x4d6   :  { %v3362_v1 = vpop.f32.mrb[133].mxu1  ;;  %3404 = vmatpush3.bf16.msra.mxu1 %v4809_v61 }
 0x4d7   :  { %v3363_v28 = vadd.f32 %v3362_v1, %v3361_v22  ;;  %v3364_v59 = vpop.f32.mrb[134].mxu1 }
 0x4d8   :  { %v3365_v46 = vpop.f32.mrb[135].mxu1 }
 0x4d9   :  { %v3366_v29 = vadd.f32 %v3365_v46, %v3364_v59 }
 0x4db   :  { %v1718_v56 = vpack.c.bf16 %v3366_v29, %v3363_v28 }
 0x4dd   :  { %v3367_v20 = vpop.f32.mrb[136].mxu1  ;;  %3405 = vmatprep.subr.bf16.mxu1 %v1718_v56  ;;  %3764 = vmatmul.mubr.bf16.gmra.mrb[80].mxu0 %v1718_v56 }
 0x4de   :  { %v3368_v39 = vpop.f32.mrb[137].mxu1  ;;  %3406 = vmatpush3.bf16.msra.mxu1 %v4812_v43 }
 0x4df   :  { %v3369_v57 = vadd.f32 %v3368_v39, %v3367_v20  ;;  %v3370_v27 = vpop.f32.mrb[138].mxu1 }
 0x4e0   :  { %v3371_v58 = vpop.f32.mrb[139].mxu1 }
 0x4e1   :  { %v3372_v51 = vadd.f32 %v3371_v58, %v3370_v27 }
 0x4e3   :  { %v1719_v41 = vpack.c.bf16 %v3372_v51, %v3369_v57 }
 0x4e5   :  { %v3373_v37 = vpop.f32.mrb[140].mxu1  ;;  %3407 = vmatprep.subr.bf16.mxu1 %v1719_v41  ;;  %3767 = vmatprep.mubr.bf16.mxu0 %v1719_v41 }
 0x4e6   :  { %v3374_v61 = vpop.f32.mrb[141].mxu1  ;;  %3408 = vmatpush3.bf16.msra.mxu1 %v4815_v49 }
 0x4e7   :  { %v3375_v63 = vadd.f32 %v3374_v61, %v3373_v37  ;;  %v3376_v22 = vpop.f32.mrb[142].mxu1 }
 0x4e8   :  { %v3377_v1 = vpop.f32.mrb[143].mxu1 }
 0x4e9   :  { %v3378_v28 = vadd.f32 %v3377_v1, %v3376_v22 }
 0x4eb   :  { %v1720_v59 = vpack.c.bf16 %v3378_v28, %v3375_v63 }
 0x4ed   :  { %v3379_v46 = vpop.f32.mrb[144].mxu1  ;;  %3409 = vmatprep.subr.bf16.mxu1 %v1720_v59  ;;  %3768 = vmatmul.mubr.bf16.gmra.mrb[84].mxu0 %v1720_v59 }
 0x4ee   :  { %v3380_v43 = vpop.f32.mrb[145].mxu1  ;;  %3410 = vmatpush3.bf16.msra.mxu1 %v4818_v47 }
 0x4ef   :  { %v3381_v39 = vadd.f32 %v3380_v43, %v3379_v46  ;;  %v3382_v29 = vpop.f32.mrb[146].mxu1 }
 0x4f0   :  { %v3383_v56 = vpop.f32.mrb[147].mxu1 }
 0x4f1   :  { %v3384_v20 = vadd.f32 %v3383_v56, %v3382_v29 }
 0x4f3   :  { %v1721_v57 = vpack.c.bf16 %v3384_v20, %v3381_v39 }
 0x4f5   :  { %v3385_v27 = vpop.f32.mrb[148].mxu1  ;;  %3411 = vmatprep.subr.bf16.mxu1 %v1721_v57  ;;  %3771 = vmatprep.mubr.bf16.mxu0 %v1721_v57  ;;  %v4132_v57 = vld [vmem:[#allocation8 + $0x80] sm:$0xff]  }
 0x4f6   :  { %v3386_v49 = vpop.f32.mrb[149].mxu1  ;;  %3412 = vmatpush3.bf16.msra.mxu1 %v4821_v55  ;;  %3827 = vmatprep.subr.bf16.mxu0 %v4132_v57 }
 0x4f7   :  { %v3387_v58 = vadd.f32 %v3386_v49, %v3385_v27  ;;  %v3388_v51 = vpop.f32.mrb[150].mxu1 }
 0x4f8   :  { %v3389_v41 = vpop.f32.mrb[151].mxu1 }
 0x4f9   :  { %v3390_v37 = vadd.f32 %v3389_v41, %v3388_v51 }
 0x4fb   :  { %v1722_v61 = vpack.c.bf16 %v3390_v37, %v3387_v58 }
 0x4fd   :  { %v3391_v63 = vpop.f32.mrb[152].mxu1  ;;  %3413 = vmatprep.subr.bf16.mxu1 %v1722_v61  ;;  %3772 = vmatmul.mubr.bf16.gmra.mrb[88].mxu0 %v1722_v61 }
 0x4fe   :  { %v3392_v47 = vpop.f32.mrb[153].mxu1  ;;  %3414 = vmatpush3.bf16.msra.mxu1 %v4824_v62  ;;  %v4133_v62 = vld [vmem:[#allocation8 + $0x88] sm:$0xff]  }
 0x4ff   :  { %v3393_v22 = vadd.f32 %v3392_v47, %v3391_v63  ;;  %v3394_v1 = vpop.f32.mrb[154].mxu1 }
 0x500   :  { %v3395_v28 = vpop.f32.mrb[155].mxu1 }
 0x501   :  { %v3396_v59 = vadd.f32 %v3395_v28, %v3394_v1 }
 0x503   :  { %v1723_v46 = vpack.c.bf16 %v3396_v59, %v3393_v22 }
 0x505   :  { %v3397_v43 = vpop.f32.mrb[156].mxu1  ;;  %3415 = vmatprep.subr.bf16.mxu1 %v1723_v46  ;;  %3775 = vmatprep.mubr.bf16.mxu0 %v1723_v46 }
 0x506   :  { %v3398_v55 = vpop.f32.mrb[157].mxu1  ;;  %3416 = vmatpush3.bf16.msra.mxu1 %v4827_v33  ;;  %v4134_v33 = vld [vmem:[#allocation8 + $0x90] sm:$0xff]  }
 0x507   :  { %v3399_v39 = vadd.f32 %v3398_v55, %v3397_v43  ;;  %v3400_v29 = vpop.f32.mrb[158].mxu1 }
 0x508   :  { %v3401_v56 = vpop.f32.mrb[159].mxu1 }
 0x509   :  { %v3402_v20 = vadd.f32 %v3401_v56, %v3400_v29 }
 0x50b   :  { %v1724_v27 = vpack.c.bf16 %v3402_v20, %v3399_v39 }
 0x50d   :  { %3417 = vmatprep.subr.bf16.mxu1 %v1724_v27  ;;  %3776 = vmatmul.mubr.bf16.gmra.mrb[92].mxu0 %v1724_v27 }
 0x50e   :  { %3418 = vmatpush3.bf16.msra.mxu1 %v4830_v53  ;;  %3795 = vmatprep.mubr.bf16.mxu0 %v4642_v21  ;;  %v4135_v53 = vld [vmem:[#allocation8 + $0x98] sm:$0xff]   ;;  %v4136_v21 = vld [vmem:[#allocation8 + $0xa0] sm:$0xff]  }
 0x511   :  { %1758 = vmatmul.mubr.bf16.vlgmr.msra.gmra.mrb[160].mxu1 %v4716_v24 }
 0x512   :  { %1765 = vmatprep.mubr.bf16.mxu1 %v4719_v31 }
 0x515   :  { %3796 = vmatmul.mubr.bf16.vlgmr.msra.gmra.mrb[64].mxu0 %v4640_v19  ;;  %v4137_v19 = vld [vmem:[#allocation8 + $0xa8] sm:$0xff]  }
 0x516   :  { %3799 = vmatprep.mubr.bf16.mxu0 %v4650_v50  ;;  %3828 = vmatpush3.bf16.msra.mxu0 %v4132_v57  ;;  %v4139_v50 = vld [vmem:[#allocation8 + $0xb8] sm:$0xff]  }
 0x517   :  { %3829 = vmatprep.subr.bf16.mxu0 %v4133_v62 }
 0x519   :  { %1766 = vmatmul.mubr.bf16.gmra.mrb[164].mxu1 %v4722_v0 }
 0x51a   :  { %1773 = vmatprep.mubr.bf16.mxu1 %v4725_v2  ;;  %3830 = vmatpush3.bf16.msra.mxu0 %v4133_v62 }
 0x51b   :  { %3831 = vmatprep.subr.bf16.mxu0 %v4134_v33 }
 0x51d   :  { %3800 = vmatmul.mubr.bf16.gmra.mrb[68].mxu0 %v4648_v48  ;;  %v4138_v48 = vld [vmem:[#allocation8 + $0xb0] sm:$0xff]  }
 0x51e   :  { %3803 = vmatprep.mubr.bf16.mxu0 %v4658_v54  ;;  %3832 = vmatpush3.bf16.msra.mxu0 %v4134_v33  ;;  %v4998_v54 = vld [vmem:[#allocation17_spill] sm:$0xff] }
 0x51f   :  { %3833 = vmatprep.subr.bf16.mxu0 %v4135_v53 }
 0x521   :  { %1774 = vmatmul.mubr.bf16.gmra.mrb[168].mxu1 %v4728_v3 }
 0x522   :  { %1781 = vmatprep.mubr.bf16.mxu1 %v4731_v4  ;;  %3834 = vmatpush3.bf16.msra.mxu0 %v4135_v53 }
 0x523   :  { %3835 = vmatprep.subr.bf16.mxu0 %v4136_v21 }
 0x525   :  { %3804 = vmatmul.mubr.bf16.gmra.mrb[72].mxu0 %v4656_v52  ;;  %v4997_v52 = vld [vmem:[#allocation15_spill] sm:$0xff] }
 0x526   :  { %3807 = vmatprep.mubr.bf16.mxu0 %v4666_v10  ;;  %3836 = vmatpush3.bf16.msra.mxu0 %v4136_v21  ;;  %v5000_v10 = vld [vmem:[#allocation20_spill] sm:$0xff] }
 0x527   :  { %3837 = vmatprep.subr.bf16.mxu0 %v4137_v19 }
 0x529   :  { %1782 = vmatmul.mubr.bf16.gmra.mrb[172].mxu1 %v4734_v5 }
 0x52a   :  { %1789 = vmatprep.mubr.bf16.mxu1 %v4737_v6  ;;  %3838 = vmatpush3.bf16.msra.mxu0 %v4137_v19 }
 0x52b   :  { %3839 = vmatprep.subr.bf16.mxu0 %v4138_v48 }
 0x52d   :  { %3808 = vmatmul.mubr.bf16.gmra.mrb[76].mxu0 %v4664_v14  ;;  %v4999_v14 = vld [vmem:[#allocation19_spill] sm:$0xff] }
 0x52e   :  { %3811 = vmatprep.mubr.bf16.mxu0 %v4674_v8  ;;  %3840 = vmatpush3.bf16.msra.mxu0 %v4138_v48  ;;  %v5002_v8 = vld [vmem:[#allocation21_spill] sm:$0xff] }
 0x52f   :  { %3841 = vmatprep.subr.bf16.mxu0 %v4139_v50 }
 0x531   :  { %1790 = vmatmul.mubr.bf16.gmra.mrb[176].mxu1 %v4740_v9 }
 0x532   :  { %1797 = vmatprep.mubr.bf16.mxu1 %v4743_v12  ;;  %3842 = vmatpush3.bf16.msra.mxu0 %v4139_v50 }
 0x535   :  { %3812 = vmatmul.mubr.bf16.gmra.mrb[80].mxu0 %v4672_v7  ;;  %v5001_v7 = vld [vmem:[#allocation18_spill] sm:$0xff] }
 0x536   :  { %3815 = vmatprep.mubr.bf16.mxu0 %v4686_v40 }
 0x539   :  { %1798 = vmatmul.mubr.bf16.gmra.mrb[180].mxu1 %v4746_v13 }
 0x53a   :  { %1805 = vmatprep.mubr.bf16.mxu1 %v4749_v15 }
 0x53d   :  { %3816 = vmatmul.mubr.bf16.gmra.mrb[84].mxu0 %v4684_v38  ;;  %v5003_v38 = vld [vmem:[#allocation22_spill] sm:$0xff] }
 0x53e   :  { %3819 = vmatprep.mubr.bf16.mxu0 %v4698_v16 }
 0x541   :  { %1806 = vmatmul.mubr.bf16.gmra.mrb[184].mxu1 %v4752_v17 }
 0x542   :  { %1813 = vmatprep.mubr.bf16.mxu1 %v4755_v23 }
 0x545   :  { %3820 = vmatmul.mubr.bf16.gmra.mrb[88].mxu0 %v4696_v11 }
 0x546   :  { %3823 = vmatprep.mubr.bf16.mxu0 %v4710_v18 }
 0x549   :  { %1814 = vmatmul.mubr.bf16.gmra.mrb[188].mxu1 %v4758_v26 }
 0x54a   :  { %1821 = vmatprep.mubr.bf16.mxu1 %v4761_v30 }
 0x54d   :  { %3824 = vmatmul.mubr.bf16.gmra.mrb[92].mxu0 %v4708_v25 }
 0x551   :  { %1822 = vmatmul.mubr.bf16.gmra.mrb[192].mxu1 %v4764_v32 }
 0x552   :  { %1829 = vmatprep.mubr.bf16.mxu1 %v4767_v34 }
 0x559   :  { %1830 = vmatmul.mubr.bf16.gmra.mrb[196].mxu1 %v4770_v35 }
 0x55a   :  { %1837 = vmatprep.mubr.bf16.mxu1 %v4773_v36 }
 0x561   :  { %1838 = vmatmul.mubr.bf16.gmra.mrb[200].mxu1 %v4776_v42 }
 0x562   :  { %1845 = vmatprep.mubr.bf16.mxu1 %v4779_v44 }
 0x569   :  { %1846 = vmatmul.mubr.bf16.gmra.mrb[204].mxu1 %v4782_v60 }
 0x56a   :  { %1853 = vmatprep.mubr.bf16.mxu1 %v4785_v45 }
 0x571   :  { %1854 = vmatmul.mubr.bf16.gmra.mrb[208].mxu1 %v4997_v52 }
 0x572   :  { %1861 = vmatprep.mubr.bf16.mxu1 %v4998_v54 }
 0x579   :  { %1862 = vmatmul.mubr.bf16.gmra.mrb[212].mxu1 %v4999_v14 }
 0x57a   :  { %1869 = vmatprep.mubr.bf16.mxu1 %v5000_v10 }
 0x581   :  { %1870 = vmatmul.mubr.bf16.gmra.mrb[216].mxu1 %v5001_v7 }
 0x582   :  { %1877 = vmatprep.mubr.bf16.mxu1 %v5002_v8 }
 0x589   :  { %1878 = vmatmul.mubr.bf16.gmra.mrb[220].mxu1 %v5003_v38 }
 0x5e4   :  { %v3419_v40 = vpop.f32.mrb[160].mxu1 }
 0x5e5   :  { %v3420_v11 = vpop.f32.mrb[161].mxu1 }
 0x5e6   :  { %v3421_v16 = vadd.f32 %v3420_v11, %v3419_v40  ;;  %v3422_v25 = vpop.f32.mrb[162].mxu1 }
 0x5e7   :  { %v3423_v18 = vpop.f32.mrb[163].mxu1 }
 0x5e8   :  { %v3424_v24 = vadd.f32 %v3423_v18, %v3422_v25 }
 0x5ea   :  { %v1886_v31 = vpack.c.bf16 %v3424_v24, %v3421_v16 }
 0x5ec   :  { %v3425_v0 = vpop.f32.mrb[164].mxu1  ;;  %3843 = vmatprep.mubr.bf16.mxu0 %v1886_v31 }
 0x5ed   :  { %v3426_v2 = vpop.f32.mrb[165].mxu1 }
 0x5ee   :  { %v3427_v3 = vadd.f32 %v3426_v2, %v3425_v0  ;;  %v3428_v4 = vpop.f32.mrb[166].mxu1 }
 0x5ef   :  { %v3429_v5 = vpop.f32.mrb[167].mxu1 }
 0x5f0   :  { %v3430_v6 = vadd.f32 %v3429_v5, %v3428_v4 }
 0x5f2   :  { %v1887_v9 = vpack.c.bf16 %v3430_v6, %v3427_v3 }
 0x5f4   :  { %3844 = vmatmul.mubr.bf16.vlgmr.msra.gmra.mrb[64].mxu0 %v1887_v9  ;;  %v3431_v12 = vpop.f32.mrb[168].mxu1 }
 0x5f5   :  { %v3432_v13 = vpop.f32.mrb[169].mxu1 }
 0x5f6   :  { %v3433_v15 = vadd.f32 %v3432_v13, %v3431_v12  ;;  %v3434_v17 = vpop.f32.mrb[170].mxu1 }
 0x5f7   :  { %v3435_v23 = vpop.f32.mrb[171].mxu1 }
 0x5f8   :  { %v3436_v26 = vadd.f32 %v3435_v23, %v3434_v17 }
 0x5fa   :  { %v1888_v30 = vpack.c.bf16 %v3436_v26, %v3433_v15 }
 0x5fc   :  { %v3437_v32 = vpop.f32.mrb[172].mxu1  ;;  %3847 = vmatprep.mubr.bf16.mxu0 %v1888_v30 }
 0x5fd   :  { %v3438_v34 = vpop.f32.mrb[173].mxu1 }
 0x5fe   :  { %v3439_v35 = vadd.f32 %v3438_v34, %v3437_v32  ;;  %v3440_v36 = vpop.f32.mrb[174].mxu1 }
 0x5ff   :  { %v3441_v42 = vpop.f32.mrb[175].mxu1 }
 0x600   :  { %v3442_v44 = vadd.f32 %v3441_v42, %v3440_v36 }
 0x602   :  { %v1889_v60 = vpack.c.bf16 %v3442_v44, %v3439_v35 }
 0x604   :  { %3848 = vmatmul.mubr.bf16.gmra.mrb[68].mxu0 %v1889_v60  ;;  %v3443_v45 = vpop.f32.mrb[176].mxu1 }
 0x605   :  { %v3444_v49 = vpop.f32.mrb[177].mxu1 }
 0x606   :  { %v3445_v58 = vadd.f32 %v3444_v49, %v3443_v45  ;;  %v3446_v51 = vpop.f32.mrb[178].mxu1 }
 0x607   :  { %v3447_v41 = vpop.f32.mrb[179].mxu1 }
 0x608   :  { %v3448_v37 = vadd.f32 %v3447_v41, %v3446_v51 }
 0x60a   :  { %v1890_v61 = vpack.c.bf16 %v3448_v37, %v3445_v58 }
 0x60c   :  { %v3449_v63 = vpop.f32.mrb[180].mxu1  ;;  %3851 = vmatprep.mubr.bf16.mxu0 %v1890_v61 }
 0x60d   :  { %v3450_v47 = vpop.f32.mrb[181].mxu1 }
 0x60e   :  { %v3451_v22 = vadd.f32 %v3450_v47, %v3449_v63  ;;  %v3452_v1 = vpop.f32.mrb[182].mxu1 }
 0x60f   :  { %v3453_v28 = vpop.f32.mrb[183].mxu1 }
 0x610   :  { %v3454_v59 = vadd.f32 %v3453_v28, %v3452_v1 }
 0x612   :  { %v1891_v46 = vpack.c.bf16 %v3454_v59, %v3451_v22 }
 0x614   :  { %3852 = vmatmul.mubr.bf16.gmra.mrb[72].mxu0 %v1891_v46  ;;  %v3455_v43 = vpop.f32.mrb[184].mxu1 }
 0x615   :  { %v3456_v55 = vpop.f32.mrb[185].mxu1 }
 0x616   :  { %v3457_v39 = vadd.f32 %v3456_v55, %v3455_v43  ;;  %v3458_v29 = vpop.f32.mrb[186].mxu1 }
 0x617   :  { %v3459_v56 = vpop.f32.mrb[187].mxu1 }
 0x618   :  { %v3460_v20 = vadd.f32 %v3459_v56, %v3458_v29 }
 0x61a   :  { %v1892_v57 = vpack.c.bf16 %v3460_v20, %v3457_v39 }
 0x61c   :  { %v3461_v27 = vpop.f32.mrb[188].mxu1  ;;  %3855 = vmatprep.mubr.bf16.mxu0 %v1892_v57  ;;  %v4891_v57 = vld [vmem:[%s4942_s5] ss:$0 sm:$0xff]  ;;  %s4298_s5 = smov [#allocation10]  }
 0x61d   :  { %v3462_v62 = vpop.f32.mrb[189].mxu1  ;;  %s2886_s23 = sshll.u32 %s4298_s5, 4  ;;  %s2887_s23 = int_to_ptr.vmem [resolvable:$true] %s2886_s23 }
 0x61e   :  { %v3463_v33 = vadd.f32 %v3462_v62, %v3461_v27  ;;  %v3464_v53 = vpop.f32.mrb[190].mxu1  ;;  %s4260_s24 = scalar_lea.vmem %s2887_s23, 16  ;;  %s4264_s25 = scalar_lea.vmem %s2887_s23, 32 }
 0x61f   :  { %v3465_v21 = vpop.f32.mrb[191].mxu1  ;;  %p4261_p4 = scmp.ne.s32.totalorder %s2887_s23, %s4260_s24  ;;  %p4265_p5 = scmp.lt.s32.totalorder %s2887_s23, %s2887_s23 }
 0x620   :  { %v3466_v19 = vadd.f32 %v3465_v21, %v3464_v53  ;;  %p4266_p6 = scmp.lt.s32.totalorder %s4264_s25, %s4260_s24 }
 0x622   :  { %v1893_v48 = vpack.c.bf16 %v3466_v19, %v3463_v33  ;;  %p4267_p7 = por %p4266_p6, %p4265_p5 }
 0x624   :  { %3856 = vmatmul.mubr.bf16.gmra.mrb[76].mxu0 %v1893_v48  ;;  %v3467_v50 = vpop.f32.mrb[192].mxu1  ;;  %p4268_p8 = pnand %p4267_p7, %p4261_p4 }
 0x625   :  { %v3468_v52 = vpop.f32.mrb[193].mxu1 }
 0x626   :  { %v3469_v54 = vadd.f32 %v3468_v52, %v3467_v50  ;;  %v3470_v14 = vpop.f32.mrb[194].mxu1 }
 0x627   :  { %v3471_v10 = vpop.f32.mrb[195].mxu1 }
 0x628   :  { %v3472_v7 = vadd.f32 %v3471_v10, %v3470_v14 }
 0x62a   :  { %v1894_v8 = vpack.c.bf16 %v3472_v7, %v3469_v54 }
 0x62c   :  { %v3473_v38 = vpop.f32.mrb[196].mxu1  ;;  %3859 = vmatprep.mubr.bf16.mxu0 %v1894_v8 }
 0x62d   :  { %v3474_v40 = vpop.f32.mrb[197].mxu1 }
 0x62e   :  { %v3475_v11 = vadd.f32 %v3474_v40, %v3473_v38  ;;  %v3476_v16 = vpop.f32.mrb[198].mxu1 }
 0x62f   :  { %v3477_v25 = vpop.f32.mrb[199].mxu1 }
 0x630   :  { %v3478_v18 = vadd.f32 %v3477_v25, %v3476_v16 }
 0x632   :  { %v1895_v24 = vpack.c.bf16 %v3478_v18, %v3475_v11 }
 0x634   :  { %3860 = vmatmul.mubr.bf16.gmra.mrb[80].mxu0 %v1895_v24  ;;  %v3479_v31 = vpop.f32.mrb[200].mxu1 }
 0x635   :  { %v3480_v0 = vpop.f32.mrb[201].mxu1 }
 0x636   :  { %v3481_v2 = vadd.f32 %v3480_v0, %v3479_v31  ;;  %v3482_v3 = vpop.f32.mrb[202].mxu1 }
 0x637   :  { %v3483_v4 = vpop.f32.mrb[203].mxu1 }
 0x638   :  { %v3484_v5 = vadd.f32 %v3483_v4, %v3482_v3 }
 0x63a   :  { %v1896_v6 = vpack.c.bf16 %v3484_v5, %v3481_v2 }
 0x63c   :  { %v3485_v9 = vpop.f32.mrb[204].mxu1  ;;  %3863 = vmatprep.mubr.bf16.mxu0 %v1896_v6 }
 0x63d   :  { %v3486_v12 = vpop.f32.mrb[205].mxu1 }
 0x63e   :  { %v3487_v13 = vadd.f32 %v3486_v12, %v3485_v9  ;;  %v3488_v15 = vpop.f32.mrb[206].mxu1 }
 0x63f   :  { %v3489_v17 = vpop.f32.mrb[207].mxu1 }
 0x640   :  { %v3490_v23 = vadd.f32 %v3489_v17, %v3488_v15 }
 0x642   :  { %v1897_v26 = vpack.c.bf16 %v3490_v23, %v3487_v13 }
 0x644   :  { %3864 = vmatmul.mubr.bf16.gmra.mrb[84].mxu0 %v1897_v26  ;;  %v3491_v30 = vpop.f32.mrb[208].mxu1 }
 0x645   :  { %v3492_v32 = vpop.f32.mrb[209].mxu1 }
 0x646   :  { %v3493_v34 = vadd.f32 %v3492_v32, %v3491_v30  ;;  %v3494_v35 = vpop.f32.mrb[210].mxu1 }
 0x647   :  { %v3495_v36 = vpop.f32.mrb[211].mxu1 }
 0x648   :  { %v3496_v42 = vadd.f32 %v3495_v36, %v3494_v35 }
 0x64a   :  { %v1898_v44 = vpack.c.bf16 %v3496_v42, %v3493_v34 }
 0x64c   :  { %v3497_v60 = vpop.f32.mrb[212].mxu1  ;;  %3867 = vmatprep.mubr.bf16.mxu0 %v1898_v44 }
 0x64d   :  { %v3498_v45 = vpop.f32.mrb[213].mxu1 }
 0x64e   :  { %v3499_v49 = vadd.f32 %v3498_v45, %v3497_v60  ;;  %v3500_v58 = vpop.f32.mrb[214].mxu1 }
 0x64f   :  { %v3501_v51 = vpop.f32.mrb[215].mxu1 }
 0x650   :  { %v3502_v41 = vadd.f32 %v3501_v51, %v3500_v58 }
 0x652   :  { %v1899_v37 = vpack.c.bf16 %v3502_v41, %v3499_v49 }
 0x654   :  { %3868 = vmatmul.mubr.bf16.gmra.mrb[88].mxu0 %v1899_v37  ;;  %v3503_v61 = vpop.f32.mrb[216].mxu1 }
 0x655   :  { %v3504_v63 = vpop.f32.mrb[217].mxu1 }
 0x656   :  { %v3505_v47 = vadd.f32 %v3504_v63, %v3503_v61  ;;  %v3506_v22 = vpop.f32.mrb[218].mxu1 }
 0x657   :  { %v3507_v1 = vpop.f32.mrb[219].mxu1 }
 0x658   :  { %v3508_v28 = vadd.f32 %v3507_v1, %v3506_v22 }
 0x65a   :  { %v1900_v59 = vpack.c.bf16 %v3508_v28, %v3505_v47 }
 0x65c   :  { %v3509_v46 = vpop.f32.mrb[220].mxu1  ;;  %3871 = vmatprep.mubr.bf16.mxu0 %v1900_v59 }
 0x65d   :  { %v3510_v43 = vpop.f32.mrb[221].mxu1 }
 0x65e   :  { %v3511_v55 = vadd.f32 %v3510_v43, %v3509_v46  ;;  %v3512_v39 = vpop.f32.mrb[222].mxu1 }
 0x65f   :  { %v3513_v29 = vpop.f32.mrb[223].mxu1 }
 0x660   :  { %v3514_v56 = vadd.f32 %v3513_v29, %v3512_v39 }
 0x662   :  { %v1901_v20 = vpack.c.bf16 %v3514_v56, %v3511_v55 }
 0x664   :  { %3872 = vmatmul.mubr.bf16.gmra.mrb[92].mxu0 %v1901_v20 }
 0x6c7   :  { %v3845_v27 = vpop.f32.mrb[64].mxu0 }
 0x6c8   :  { %v2450_v62 = vpop.f32.mrb[65].mxu0  ;;  %v2618_v19 = vadd.f32 %v3845_v27, %v4891_v57 }
 0x6c9   :  { %v2616_v33 = vadd.f32 %v4891_v57, %v2450_v62  ;;  %v3846_v53 = vpop.f32.mrb[66].mxu0 }
 0x6ca   :  { %v2453_v21 = vpop.f32.mrb[67].mxu0  ;;  %v2619_v52 = vadd.f32 %v3846_v53, %v4891_v57  ;;  %v2650_v14 = vmax.f32 %v2618_v19, 0.0 }
 0x6cb   :  { %v2617_v48 = vadd.f32 %v4891_v57, %v2453_v21  ;;  %v2648_v50 = vmax.f32 %v2616_v33, 0.0 }
 0x6cc   :  { %v2651_v7 = vmax.f32 %v2619_v52, 0.0 }
 0x6cd   :  { %v2649_v54 = vmax.f32 %v2617_v48, 0.0 }
 0x6cf   :  { %v2841_v10 = vadd.f32 %v2649_v54, %v2648_v50 }
 0x6d1   :  { %v2842_v8 = vadd.f32 %v2841_v10, %v2650_v14 }
 0x6d3   :  { %v2843_v38 = vadd.f32 %v2842_v8, %v2651_v7 }
 0x6d7   :  { %v3849_v40 = vpop.f32.mrb[68].mxu0 }
 0x6d8   :  { %v2466_v11 = vpop.f32.mrb[69].mxu0  ;;  %v2622_v24 = vadd.f32 %v3849_v40, %v4891_v57 }
 0x6d9   :  { %v2620_v16 = vadd.f32 %v4891_v57, %v2466_v11  ;;  %v3850_v25 = vpop.f32.mrb[70].mxu0 }
 0x6da   :  { %v2469_v18 = vpop.f32.mrb[71].mxu0  ;;  %v2623_v3 = vadd.f32 %v3850_v25, %v4891_v57  ;;  %v2654_v5 = vmax.f32 %v2622_v24, 0.0 }
 0x6db   :  { %v2652_v31 = vmax.f32 %v2620_v16, 0.0  ;;  %v2621_v0 = vadd.f32 %v4891_v57, %v2469_v18 }
 0x6dc   :  { %v2655_v9 = vmax.f32 %v2623_v3, 0.0 }
 0x6dd   :  { %v2844_v2 = vadd.f32 %v2843_v38, %v2652_v31  ;;  %v2653_v4 = vmax.f32 %v2621_v0, 0.0 }
 0x6df   :  { %v2845_v6 = vadd.f32 %v2844_v2, %v2653_v4 }
 0x6e1   :  { %v2846_v12 = vadd.f32 %v2845_v6, %v2654_v5 }
 0x6e3   :  { %v2847_v13 = vadd.f32 %v2846_v12, %v2655_v9 }
 0x6e7   :  { %v3853_v15 = vpop.f32.mrb[72].mxu0 }
 0x6e8   :  { %v2482_v17 = vpop.f32.mrb[73].mxu0  ;;  %v2626_v32 = vadd.f32 %v3853_v15, %v4891_v57 }
 0x6e9   :  { %v2624_v23 = vadd.f32 %v4891_v57, %v2482_v17  ;;  %v3854_v26 = vpop.f32.mrb[74].mxu0 }
 0x6ea   :  { %v2485_v30 = vpop.f32.mrb[75].mxu0  ;;  %v2627_v42 = vadd.f32 %v3854_v26, %v4891_v57  ;;  %v2658_v60 = vmax.f32 %v2626_v32, 0.0 }
 0x6eb   :  { %v2656_v34 = vmax.f32 %v2624_v23, 0.0  ;;  %v2625_v35 = vadd.f32 %v4891_v57, %v2485_v30 }
 0x6ec   :  { %v2659_v49 = vmax.f32 %v2627_v42, 0.0 }
 0x6ed   :  { %v2848_v36 = vadd.f32 %v2847_v13, %v2656_v34  ;;  %v2657_v44 = vmax.f32 %v2625_v35, 0.0 }
 0x6ef   :  { %v2849_v45 = vadd.f32 %v2848_v36, %v2657_v44 }
 0x6f1   :  { %v2850_v58 = vadd.f32 %v2849_v45, %v2658_v60 }
 0x6f3   :  { %v2851_v51 = vadd.f32 %v2850_v58, %v2659_v49 }
 0x6f7   :  { %v3857_v41 = vpop.f32.mrb[76].mxu0 }
 0x6f8   :  { %v2498_v37 = vpop.f32.mrb[77].mxu0  ;;  %v2630_v22 = vadd.f32 %v3857_v41, %v4891_v57 }
 0x6f9   :  { %v2628_v61 = vadd.f32 %v4891_v57, %v2498_v37  ;;  %v3858_v63 = vpop.f32.mrb[78].mxu0 }
 0x6fa   :  { %v2501_v47 = vpop.f32.mrb[79].mxu0  ;;  %v2631_v46 = vadd.f32 %v3858_v63, %v4891_v57  ;;  %v2662_v55 = vmax.f32 %v2630_v22, 0.0 }
 0x6fb   :  { %v2660_v1 = vmax.f32 %v2628_v61, 0.0  ;;  %v2629_v28 = vadd.f32 %v4891_v57, %v2501_v47 }
 0x6fc   :  { %v2663_v29 = vmax.f32 %v2631_v46, 0.0 }
 0x6fd   :  { %v2852_v59 = vadd.f32 %v2851_v51, %v2660_v1  ;;  %v2661_v43 = vmax.f32 %v2629_v28, 0.0 }
 0x6ff   :  { %v2853_v39 = vadd.f32 %v2852_v59, %v2661_v43 }
 0x701   :  { %v2854_v56 = vadd.f32 %v2853_v39, %v2662_v55 }
 0x703   :  { %v2855_v20 = vadd.f32 %v2854_v56, %v2663_v29 }
 0x707   :  { %v3861_v27 = vpop.f32.mrb[80].mxu0 }
 0x708   :  { %v2514_v62 = vpop.f32.mrb[81].mxu0  ;;  %v2634_v19 = vadd.f32 %v3861_v27, %v4891_v57 }
 0x709   :  { %v2632_v33 = vadd.f32 %v4891_v57, %v2514_v62  ;;  %v3862_v53 = vpop.f32.mrb[82].mxu0 }
 0x70a   :  { %v2517_v21 = vpop.f32.mrb[83].mxu0  ;;  %v2635_v54 = vadd.f32 %v3862_v53, %v4891_v57  ;;  %v2666_v10 = vmax.f32 %v2634_v19, 0.0 }
 0x70b   :  { %v2664_v48 = vmax.f32 %v2632_v33, 0.0  ;;  %v2633_v50 = vadd.f32 %v4891_v57, %v2517_v21 }
 0x70c   :  { %v2667_v8 = vmax.f32 %v2635_v54, 0.0 }
 0x70d   :  { %v2856_v52 = vadd.f32 %v2855_v20, %v2664_v48  ;;  %v2665_v14 = vmax.f32 %v2633_v50, 0.0 }
 0x70f   :  { %v2857_v7 = vadd.f32 %v2856_v52, %v2665_v14 }
 0x711   :  { %v2858_v38 = vadd.f32 %v2857_v7, %v2666_v10 }
 0x713   :  { %v2859_v40 = vadd.f32 %v2858_v38, %v2667_v8 }
 0x717   :  { %v3865_v11 = vpop.f32.mrb[84].mxu0 }
 0x718   :  { %v2530_v16 = vpop.f32.mrb[85].mxu0  ;;  %v2638_v31 = vadd.f32 %v3865_v11, %v4891_v57 }
 0x719   :  { %v2636_v25 = vadd.f32 %v4891_v57, %v2530_v16  ;;  %v3866_v18 = vpop.f32.mrb[86].mxu0 }
 0x71a   :  { %v2533_v24 = vpop.f32.mrb[87].mxu0  ;;  %v2639_v4 = vadd.f32 %v3866_v18, %v4891_v57  ;;  %v2670_v6 = vmax.f32 %v2638_v31, 0.0 }
 0x71b   :  { %v2668_v0 = vmax.f32 %v2636_v25, 0.0  ;;  %v2637_v2 = vadd.f32 %v4891_v57, %v2533_v24 }
 0x71c   :  { %v2671_v12 = vmax.f32 %v2639_v4, 0.0 }
 0x71d   :  { %v2860_v3 = vadd.f32 %v2859_v40, %v2668_v0  ;;  %v2669_v5 = vmax.f32 %v2637_v2, 0.0 }
 0x71f   :  { %v2861_v9 = vadd.f32 %v2860_v3, %v2669_v5 }
 0x721   :  { %v2862_v13 = vadd.f32 %v2861_v9, %v2670_v6 }
 0x723   :  { %v2863_v15 = vadd.f32 %v2862_v13, %v2671_v12 }
 0x727   :  { %v3869_v17 = vpop.f32.mrb[88].mxu0 }
 0x728   :  { %v2546_v23 = vpop.f32.mrb[89].mxu0  ;;  %v2642_v26 = vadd.f32 %v3869_v17, %v4891_v57 }
 0x729   :  { %v2640_v30 = vadd.f32 %v4891_v57, %v2546_v23  ;;  %v3870_v32 = vpop.f32.mrb[90].mxu0 }
 0x72a   :  { %v2549_v34 = vpop.f32.mrb[91].mxu0  ;;  %v2643_v36 = vadd.f32 %v3870_v32, %v4891_v57  ;;  %v2674_v44 = vmax.f32 %v2642_v26, 0.0 }
 0x72b   :  { %v2672_v35 = vmax.f32 %v2640_v30, 0.0  ;;  %v2641_v42 = vadd.f32 %v4891_v57, %v2549_v34 }
 0x72c   :  { %v2675_v49 = vmax.f32 %v2643_v36, 0.0  ;;  %v2835_v51 = vmul.f32 0.0, %v2674_v44 }
 0x72d   :  { %v2864_v60 = vadd.f32 %v2863_v15, %v2672_v35  ;;  %v2673_v45 = vmax.f32 %v2641_v42, 0.0 }
 0x72e   :  { %v2836_v37 = vmul.f32 0.0, %v2675_v49 }
 0x72f   :  { %v2834_v58 = vmul.f32 0.0, %v2673_v45 }
 0x731   :  { %v2865_v41 = vadd.f32 %v2864_v60, %v2834_v58 }
 0x733   :  { %v2866_v61 = vadd.f32 %v2865_v41, %v2835_v51 }
 0x735   :  { %v2867_v63 = vadd.f32 %v2866_v61, %v2836_v37 }
 0x737   :  { %v3873_v47 = vpop.f32.mrb[92].mxu0 }
 0x738   :  { %v2562_v22 = vpop.f32.mrb[93].mxu0  ;;  %v2646_v1 = vadd.f32 %v3873_v47, %v4891_v57 }
 0x739   :  { %v2644_v28 = vadd.f32 %v4891_v57, %v2562_v22  ;;  %v3874_v59 = vpop.f32.mrb[94].mxu0 }
 0x73a   :  { %v2565_v46 = vpop.f32.mrb[95].mxu0  ;;  %v2647_v55 = vadd.f32 %v3874_v59, %v4891_v57  ;;  %v2678_v29 = vmax.f32 %v2646_v1, 0.0 }
 0x73b   :  { %v2676_v43 = vmax.f32 %v2644_v28, 0.0  ;;  %v2645_v39 = vadd.f32 %v4891_v57, %v2565_v46 }
 0x73c   :  { %v2679_v62 = vmax.f32 %v2647_v55, 0.0  ;;  %v2839_v53 = vmul.f32 0.0, %v2678_v29 }
 0x73d   :  { %v2837_v56 = vmul.f32 0.0, %v2676_v43  ;;  %v2677_v20 = vmax.f32 %v2645_v39, 0.0 }
 0x73e   :  { %v2840_v19 = vmul.f32 0.0, %v2679_v62 }
 0x73f   :  { %v2868_v27 = vadd.f32 %v2867_v63, %v2837_v56  ;;  %v2838_v33 = vmul.f32 0.0, %v2677_v20 }
 0x741   :  { %v2869_v21 = vadd.f32 %v2868_v27, %v2838_v33 }
 0x743   :  { %v2870_v48 = vadd.f32 %v2869_v21, %v2839_v53 }
 0x745   :  { %v2871_v50 = vadd.f32 %v2870_v48, %v2840_v19 }
 0x747   :  { %v2872_v52 = vrot.slane %v2871_v50, 4 }
 0x749   :  { %v2873_v54 = vadd.f32 %v2872_v52, %v2871_v50 }
 0x74b   :  { %v2874_v14 = vrot.slane %v2873_v54, 2 }
 0x74d   :  { %v2875_v10 = vadd.f32 %v2874_v14, %v2873_v54 }
 0x74f   :  { %v2876_v7 = vrot.slane %v2875_v10, 1 }
 0x751   :  { %v2877_v8 = vadd.f32 %v2876_v7, %v2875_v10 }
 0x753   :  { %v2878_v57 = vmul.f32 0.005, %v2877_v8 }
 0x755   :  { %2879 = vst [vmem:[#allocation10] sm:$0x1] %v2878_v57 }
 0x756   :  { %4271 = shalt.err (!%p4268_p8)
}
 0x757   :  { %s4272_s28 = scalar_lea.hbm %s4943_s6, 16 }
 0x758   :  { %p4273_p9 = scmp.ne.s32.totalorder %s4943_s6, %s4272_s28  ;;  %p4276_p10 = scmp.lt.u32.totalorder %s4272_s28, %s4943_s6 }
 0x75a   :  { %p4278_p11 = pnand %p4276_p10, %p4273_p9 }
 0x75c   :  { %4281 = shalt.err (!%p4278_p11)
}
 0x75d   :  { %2889 = dma.vmem_to_hbm [thread:$0]  %s2887_s23, 16, %s4943_s6, [#allocation4]  }
 0x75e   :  { %4288 = dma.done.wait [#allocation4], 16  }
 0x75f   :  { %4289 = vsyncadd [#allocation4], 4294967280 }
 0x760   :  { %2893 = vsyncpa [#allocation3], 1 }
 0x761   :  { %2894 = vsyncpa [#allocation6], 1 }
 0x762   :  { %2895 = vsyncpa [#allocation9], 1 }
 0x763   :  { %2896 = vsyncpa [#allocation4], 1 }

</bundles_post_ra>
